<compile_context>
chip_gen: v6e
topology: v6e:2x2x1
jax: 0.10.0
libtpu: 0.0.40
codegen_flags: <defaults>
</compile_context>

<pallas_src>
import functools
import math

import jax
import jax.numpy as jnp
from jax.experimental import pallas as pl
from jax.experimental.pallas import tpu as pltpu

# ----------------------------- model config ---------------------------------
BATCH = 2
SEQ_LEN = 8
INPUT_DIM = 16
EMBED_DIM = 32
NUM_HEADS = 4
NUM_LAYERS = 2
FORWARD_DIM = 64
LN_EPS = 1e-5


# ------------------------------- kernel --------------------------------------
def fused_transformer_kernel(
    x_ref,        # (B*S, Din)                input rows (batch folded on sublanes)
    c32_ref,      # (Din + B*S + H*B*S, E)    [ emb_w^T | pos+emb_b (tiled) | head masks ]
    c16_ref,      # (H*B*S + B, B*S)          [ head-tiled block-diag batch bias | pool matrix ]
    wqkv_ref,     # (L, E, 3E)                Q half pre-scaled by 1/sqrt(hd)
    wo_ref,       # (L, E, E)
    w1_ref,       # (L, E, FF)
    w2_ref,       # (L, FF, E)
    vpack_ref,    # (L, 8, 3E)                rows: bqkv | b1 | bo | g1 | be1 | b2 | g2 | be2
    outp_ref,     # (E + 1, 1)                [ out_w ; out_b ]
    o_ref,        # (B, 1)
    *, num_layers, num_heads, batch, seq):
    BS = batch * seq
    HBS = num_heads * BS
    Din = x_ref.shape[1]
    E = wo_ref.shape[-1]
    FF = w1_ref.shape[-1]

    # ---- unpack host-precomputed constants (sublane-aligned static slices) ----
    emb_w = c32_ref[0:Din, :]                          # (Din, E)
    pos_b = c32_ref[Din:Din + BS, :]                   # (BS, E)   pos (tiled) + emb_b
    head_mask = c32_ref[Din + BS:Din + BS + HBS, :]    # (HBS, E)  per-head lane masks

    bias_stack = c16_ref[0:HBS, :]                     # (HBS, BS) block-diag batch bias
    pool_mat = c16_ref[HBS:HBS + batch, :]             # (B, BS)   mean-pool matrix

    # ---- embedding + positional (+ embedding bias folded into pos_b) ----
    y = jnp.dot(x_ref[...], emb_w, preferred_element_type=jnp.float32) + pos_b   # (BS, E)

    # ---- encoder layers (statically unrolled) ----
    for l in range(num_layers):
        vp = vpack_ref[l]                              # (8, 3E)
        b_qkv = vp[0:1, :]                             # (1, 3E)  (Q part pre-scaled)
        b1 = vp[1:2, 0:FF]                             # (1, FF)
        bo = vp[2:3, 0:E]
        g1 = vp[3:4, 0:E]
        be1 = vp[4:5, 0:E]
        b2 = vp[5:6, 0:E]
        g2 = vp[6:7, 0:E]
        be2 = vp[7:8, 0:E]

        # fused Q/K/V projection: one MXU push, then static lane slices
        qkv = jnp.dot(y, wqkv_ref[l], preferred_element_type=jnp.float32) + b_qkv
        q = qkv[:, 0:E]                                # already scaled by 1/sqrt(hd)
        k = qkv[:, E:2 * E]
        v = qkv[:, 2 * E:3 * E]

        # head-stacked attention: heads on the sublane axis -> one softmax chain
        q_stack = jnp.concatenate([q] * num_heads, axis=0) * head_mask      # (HBS, E)
        s = jax.lax.dot_general(q_stack, k, (((1,), (1,)), ((), ())),
                                preferred_element_type=jnp.float32)         # (HBS, BS)
        s = s + bias_stack
        s = s - jnp.max(s, axis=-1, keepdims=True)     # keep: makes the -1e30 bias safe
        p = jnp.exp(s)
        p = p * pl.reciprocal(jnp.sum(p, axis=-1, keepdims=True), approx=True)

        # one PV matmul for all heads, then mask + sublane-block sum = concat(heads)
        pv = jnp.dot(p, v, preferred_element_type=jnp.float32) * head_mask  # (HBS, E)
        attn = pv[0:BS, :]
        for h in range(1, num_heads):
            attn = attn + pv[h * BS:(h + 1) * BS, :]
        attn = jnp.dot(attn, wo_ref[l], preferred_element_type=jnp.float32) + bo

        # residual + LayerNorm 1 (post-norm)
        y1 = y + attn
        mu1 = jnp.mean(y1, axis=-1, keepdims=True)
        d1 = y1 - mu1
        var1 = jnp.mean(d1 * d1, axis=-1, keepdims=True)
        y = d1 * jax.lax.rsqrt(var1 + LN_EPS) * g1 + be1

        # feed-forward: Linear -> ReLU -> Linear
        h1 = jnp.dot(y, w1_ref[l], preferred_element_type=jnp.float32) + b1
        h1 = jnp.maximum(h1, 0.0)
        ff = jnp.dot(h1, w2_ref[l], preferred_element_type=jnp.float32) + b2

        # residual + LayerNorm 2
        y2 = y + ff
        mu2 = jnp.mean(y2, axis=-1, keepdims=True)
        d2 = y2 - mu2
        var2 = jnp.mean(d2 * d2, axis=-1, keepdims=True)
        y = d2 * jax.lax.rsqrt(var2 + LN_EPS) * g2 + be2

    # ---- mean-pool over sequence (per batch) + output head ----
    pooled = jnp.dot(pool_mat, y, preferred_element_type=jnp.float32)        # (B, E)
    out_w = outp_ref[0:E, :]                                                 # (E, 1)
    out_b = outp_ref[E:E + 1, :]                                             # (1, 1)
    o_ref[...] = jnp.dot(pooled, out_w, preferred_element_type=jnp.float32) + out_b


# ------------------------------ wrapper ---------------------------------------
def transformer_forward_pallas(x, params):
    B, S, Din = x.shape
    x2 = x.reshape(B * S, Din)                      # fold batch onto sublanes

    operands = (
        x2,
        params["c32"], params["c16"],
        params["w_qkv"], params["w_o"], params["w_1"], params["w_2"],
        params["vpack"], params["out_pack"],
    )
    kern = functools.partial(
        fused_transformer_kernel,
        num_layers=NUM_LAYERS, num_heads=NUM_HEADS, batch=B, seq=S)
    return pl.pallas_call(
        kern,
        out_shape=jax.ShapeDtypeStruct((B, 1), jnp.float32),
        in_specs=[pl.BlockSpec(memory_space=pltpu.MemorySpace.VMEM)] * len(operands),
        out_specs=pl.BlockSpec(memory_space=pltpu.MemorySpace.VMEM),
    )(*operands)


# --------------------------- parameter init -----------------------------------
def init_params(key):
    state = {"key": key}

    def split():
        state["key"], sub = jax.random.split(state["key"])
        return sub

    def nrm(shape, s=0.05):
        return (s * jax.random.normal(split(), shape)).astype(jnp.float32)

    L, E, FF, Din, S = NUM_LAYERS, EMBED_DIM, FORWARD_DIM, INPUT_DIM, SEQ_LEN
    B, H = BATCH, NUM_HEADS
    hd = E // H
    BS = B * S

    params = {
        # nn.Linear(input_dim, E): weight (E, Din) -> stored transposed (Din, E)
        "emb_w_t": nrm((Din, E)),
        "emb_b": nrm((1, E)),
        # nn.Parameter(1, S, E) -> stored (S, E)
        "pos": nrm((S, E)),
        # MHA in_proj split into q/k/v, each (E, E)^T, stacked over layers
        "wq_t": nrm((L, E, E)), "wk_t": nrm((L, E, E)), "wv_t": nrm((L, E, E)),
        "bq": nrm((L, 1, E)), "bk": nrm((L, 1, E)), "bv": nrm((L, 1, E)),
        "wo_t": nrm((L, E, E)), "bo": nrm((L, 1, E)),
        "g1": jnp.ones((L, 1, E), jnp.float32),
        "be1": jnp.zeros((L, 1, E), jnp.float32),
        "w1_t": nrm((L, E, FF)), "b1": nrm((L, 1, FF)),
        "w2_t": nrm((L, FF, E)), "b2": nrm((L, 1, E)),
        "g2": jnp.ones((L, 1, E), jnp.float32),
        "be2": jnp.zeros((L, 1, E), jnp.float32),
        # nn.Linear(E, 1): weight (1, E) -> transposed (E, 1)
        "out_w_t": nrm((E, 1)),
        "out_b": nrm((1, 1)),
    }

    # -------- host-side packing for the fused kernel (review items 1,3,4,5) --------
    scale = 1.0 / math.sqrt(hd)

    # (Din + BS + H*BS, E) slab: embedding weight | tiled pos + emb_b | head lane masks
    pos_b = jnp.tile(params["pos"], (B, 1)) + params["emb_b"]                 # (BS, E)
    col = jnp.arange(E)
    head_mask = jnp.concatenate(
        [jnp.broadcast_to(((col // hd) == h).astype(jnp.float32)[None, :], (BS, E))
         for h in range(H)], axis=0)                                          # (H*BS, E)
    params["c32"] = jnp.concatenate([params["emb_w_t"], pos_b, head_mask], axis=0)

    # (H*BS + B, BS) slab: head-tiled block-diagonal batch bias | mean-pool matrix
    r = jnp.arange(BS)[:, None] // S
    c = jnp.arange(BS)[None, :] // S
    bbias = jnp.where(r == c, 0.0, -1e30).astype(jnp.float32)                 # (BS, BS)
    pool = jnp.where(jnp.arange(B)[:, None] == c, 1.0 / S, 0.0).astype(jnp.float32)
    params["c16"] = jnp.concatenate([jnp.tile(bbias, (H, 1)), pool], axis=0)

    # fused QKV weights/biases; 1/sqrt(hd) folded into the Q half
    params["w_qkv"] = jnp.concatenate(
        [params["wq_t"] * scale, params["wk_t"], params["wv_t"]], axis=2)     # (L, E, 3E)
    b_qkv = jnp.concatenate(
        [params["bq"] * scale, params["bk"], params["bv"]], axis=2)           # (L, 1, 3E)

    # all remaining per-layer vectors in one (L, 8, 3E) slab (zero-padded on lanes)
    def pad3e(v):
        return jnp.pad(v, ((0, 0), (0, 0), (0, 3 * E - v.shape[-1])))
    params["vpack"] = jnp.concatenate(
        [b_qkv, pad3e(params["b1"]), pad3e(params["bo"]),
         pad3e(params["g1"]), pad3e(params["be1"]),
         pad3e(params["b2"]), pad3e(params["g2"]), pad3e(params["be2"])], axis=1)

    params["w_o"] = params["wo_t"]
    params["w_1"] = params["w1_t"]
    params["w_2"] = params["w2_t"]
    params["out_pack"] = jnp.concatenate([params["out_w_t"], params["out_b"]], axis=0)
    return params


# ---------------------------- pure-JAX reference -------------------------------
def _layer_norm(x, g, b):
    mu = x.mean(-1, keepdims=True)
    var = ((x - mu) ** 2).mean(-1, keepdims=True)
    return (x - mu) * jax.lax.rsqrt(var + LN_EPS) * g + b


def reference_forward(x, params):
    B, S, _ = x.shape
    E = params["emb_w_t"].shape[1]
    H, hd = NUM_HEADS, E // NUM_HEADS
    y = x @ params["emb_w_t"] + params["emb_b"] + params["pos"][None]
    for l in range(NUM_LAYERS):
        q = y @ params["wq_t"][l] + params["bq"][l]
        k = y @ params["wk_t"][l] + params["bk"][l]
        v = y @ params["wv_t"][l] + params["bv"][l]
        qh = q.reshape(B, S, H, hd).transpose(0, 2, 1, 3)
        kh = k.reshape(B, S, H, hd).transpose(0, 2, 1, 3)
        vh = v.reshape(B, S, H, hd).transpose(0, 2, 1, 3)
        s = jnp.einsum("bhqd,bhkd->bhqk", qh, kh) / math.sqrt(hd)
        p = jax.nn.softmax(s, axis=-1)
        a = jnp.einsum("bhqk,bhkd->bhqd", p, vh).transpose(0, 2, 1, 3).reshape(B, S, E)
        a = a @ params["wo_t"][l] + params["bo"][l]
        y = _layer_norm(y + a, params["g1"][l], params["be1"][l])
        f = (jax.nn.relu(y @ params["w1_t"][l] + params["b1"][l])
             @ params["w2_t"][l] + params["b2"][l])
        y = _layer_norm(y + f, params["g2"][l], params["be2"][l])
    pooled = y.mean(axis=1)
    return pooled @ params["out_w_t"] + params["out_b"]


# --------------------------------- main ----------------------------------------
if __name__ == "__main__":
    key = jax.random.PRNGKey(0)
    k_x, k_p = jax.random.split(key)
    x = jax.random.normal(k_x, (BATCH, SEQ_LEN, INPUT_DIM), dtype=jnp.float32)
    params = init_params(k_p)

    out = transformer_forward_pallas(x, params)
    out = jax.block_until_ready(out)

    ref = reference_forward(x, params)
    assert out.shape == (BATCH, 1)
    # Tolerance 5e-4 (instead of 1e-4): pl.reciprocal(approx=True) contributes
    # ~2^-12 relative error per softmax row (review's noted trade-off); real
    # implementation bugs produce errors orders of magnitude larger.
    assert jnp.allclose(out, ref, rtol=5e-4, atol=5e-4), (out, ref)

    print("KERNEL_OK")
</pallas_src>

<mosaic_0001>
module attributes {stable_mosaic.version = 11 : i64} {
  func.func @fused_transformer_kernel(%arg0: memref<16x16xf32, #tpu.memory_space<vmem>>, %arg1: memref<96x32xf32, #tpu.memory_space<vmem>>, %arg2: memref<66x16xf32, #tpu.memory_space<vmem>>, %arg3: memref<2x32x96xf32, #tpu.memory_space<vmem>>, %arg4: memref<2x32x32xf32, #tpu.memory_space<vmem>>, %arg5: memref<2x32x64xf32, #tpu.memory_space<vmem>>, %arg6: memref<2x64x32xf32, #tpu.memory_space<vmem>>, %arg7: memref<2x8x96xf32, #tpu.memory_space<vmem>>, %arg8: memref<33x1xf32, #tpu.memory_space<vmem>>, %arg9: memref<2x1xf32, #tpu.memory_space<vmem>>) attributes {dimension_semantics = [], scalar_prefetch = 0 : i64, scratch_operands = 0 : i64, tpu.core_type = #tpu.core_type<tc>} {
    %c0 = arith.constant 0 : index
    %c0_0 = arith.constant 0 : index
    %0 = vector.load %arg1[%c0, %c0_0] : memref<96x32xf32, #tpu.memory_space<vmem>>, vector<16x32xf32>
    %c16 = arith.constant 16 : index
    %c0_1 = arith.constant 0 : index
    %1 = vector.load %arg1[%c16, %c0_1] : memref<96x32xf32, #tpu.memory_space<vmem>>, vector<16x32xf32>
    %c32 = arith.constant 32 : index
    %c0_2 = arith.constant 0 : index
    %2 = vector.load %arg1[%c32, %c0_2] : memref<96x32xf32, #tpu.memory_space<vmem>>, vector<64x32xf32>
    %c0_3 = arith.constant 0 : index
    %c0_4 = arith.constant 0 : index
    %3 = vector.load %arg2[%c0_3, %c0_4] : memref<66x16xf32, #tpu.memory_space<vmem>>, vector<64x16xf32>
    %c64 = arith.constant 64 : index
    %c0_5 = arith.constant 0 : index
    %4 = vector.load %arg2[%c64, %c0_5] : memref<66x16xf32, #tpu.memory_space<vmem>>, vector<2x16xf32>
    %c0_6 = arith.constant 0 : index
    %c0_7 = arith.constant 0 : index
    %5 = vector.load %arg0[%c0_6, %c0_7] : memref<16x16xf32, #tpu.memory_space<vmem>>, vector<16x16xf32>
    %cst = arith.constant dense<0.000000e+00> : vector<16x32xf32>
    %6 = tpu.matmul %5, %0, %cst {dimension_numbers = #tpu.dot_dimension_numbers<[1], [0], [0], [1], [0, 0, 1, 1], [], []>} : vector<16x16xf32>, vector<16x32xf32>, vector<16x32xf32> -> vector<16x32xf32>
    %7 = arith.addf %6, %1 : vector<16x32xf32>
    %c0_8 = arith.constant 0 : index
    %c0_9 = arith.constant 0 : index
    %c0_10 = arith.constant 0 : index
    %8 = vector.load %arg7[%c0_8, %c0_9, %c0_10] : memref<2x8x96xf32, #tpu.memory_space<vmem>>, vector<1x8x96xf32>
    %9 = vector.shape_cast %8 : vector<1x8x96xf32> to vector<8x96xf32>
    %10 = vector.extract_strided_slice %9 {offsets = [0, 0], sizes = [1, 96], strides = [1, 1]} : vector<8x96xf32> to vector<1x96xf32>
    %11 = vector.extract_strided_slice %9 {offsets = [1, 0], sizes = [1, 64], strides = [1, 1]} : vector<8x96xf32> to vector<1x64xf32>
    %12 = vector.extract_strided_slice %9 {offsets = [2, 0], sizes = [1, 32], strides = [1, 1]} : vector<8x96xf32> to vector<1x32xf32>
    %13 = vector.extract_strided_slice %9 {offsets = [3, 0], sizes = [1, 32], strides = [1, 1]} : vector<8x96xf32> to vector<1x32xf32>
    %14 = vector.extract_strided_slice %9 {offsets = [4, 0], sizes = [1, 32], strides = [1, 1]} : vector<8x96xf32> to vector<1x32xf32>
    %15 = vector.extract_strided_slice %9 {offsets = [5, 0], sizes = [1, 32], strides = [1, 1]} : vector<8x96xf32> to vector<1x32xf32>
    %16 = vector.extract_strided_slice %9 {offsets = [6, 0], sizes = [1, 32], strides = [1, 1]} : vector<8x96xf32> to vector<1x32xf32>
    %17 = vector.extract_strided_slice %9 {offsets = [7, 0], sizes = [1, 32], strides = [1, 1]} : vector<8x96xf32> to vector<1x32xf32>
    %c0_11 = arith.constant 0 : index
    %c0_12 = arith.constant 0 : index
    %c0_13 = arith.constant 0 : index
    %18 = vector.load %arg3[%c0_11, %c0_12, %c0_13] : memref<2x32x96xf32, #tpu.memory_space<vmem>>, vector<1x32x96xf32>
    %19 = vector.shape_cast %18 : vector<1x32x96xf32> to vector<32x96xf32>
    %cst_14 = arith.constant dense<0.000000e+00> : vector<16x96xf32>
    %20 = tpu.matmul %7, %19, %cst_14 {dimension_numbers = #tpu.dot_dimension_numbers<[1], [0], [0], [1], [0, 0, 1, 1], [], []>} : vector<16x32xf32>, vector<32x96xf32>, vector<16x96xf32> -> vector<16x96xf32>
    %21 = vector.broadcast %10 : vector<1x96xf32> to vector<16x96xf32>
    %22 = arith.addf %20, %21 : vector<16x96xf32>
    %23 = vector.extract_strided_slice %22 {offsets = [0, 0], sizes = [16, 32], strides = [1, 1]} : vector<16x96xf32> to vector<16x32xf32>
    %24 = vector.extract_strided_slice %22 {offsets = [0, 32], sizes = [16, 32], strides = [1, 1]} : vector<16x96xf32> to vector<16x32xf32>
    %25 = vector.extract_strided_slice %22 {offsets = [0, 64], sizes = [16, 32], strides = [1, 1]} : vector<16x96xf32> to vector<16x32xf32>
    %26 = tpu.concatenate %23, %23, %23, %23 in 0 : vector<16x32xf32>, vector<16x32xf32>, vector<16x32xf32>, vector<16x32xf32> -> vector<64x32xf32>
    %27 = arith.mulf %26, %2 : vector<64x32xf32>
    %cst_15 = arith.constant dense<0.000000e+00> : vector<64x16xf32>
    %28 = tpu.matmul %27, %24, %cst_15 {dimension_numbers = #tpu.dot_dimension_numbers<[1], [1], [0], [0], [0, 0, 1, 0], [], []>} : vector<64x32xf32>, vector<16x32xf32>, vector<64x16xf32> -> vector<64x16xf32>
    %29 = arith.addf %28, %3 : vector<64x16xf32>
    %cst_16 = arith.constant dense<0xFF800000> : vector<64xf32>
    %30 = vector.multi_reduction <maximumf>, %29, %cst_16 [1] : vector<64x16xf32> to vector<64xf32>
    %31 = vector.shape_cast %30 : vector<64xf32> to vector<64x1xf32>
    %32 = vector.broadcast %31 : vector<64x1xf32> to vector<64x16xf32>
    %33 = arith.subf %29, %32 : vector<64x16xf32>
    %34 = math.exp %33 : vector<64x16xf32>
    %cst_17 = arith.constant dense<0.000000e+00> : vector<64xf32>
    %35 = vector.multi_reduction <add>, %34, %cst_17 [1] : vector<64x16xf32> to vector<64xf32>
    %36 = vector.shape_cast %35 : vector<64xf32> to vector<64x1xf32>
    %37 = tpu.reciprocal %36 {approx = true} : vector<64x1xf32> -> vector<64x1xf32>
    %38 = vector.broadcast %37 : vector<64x1xf32> to vector<64x16xf32>
    %39 = arith.mulf %34, %38 : vector<64x16xf32>
    %cst_18 = arith.constant dense<0.000000e+00> : vector<64x32xf32>
    %40 = tpu.matmul %39, %25, %cst_18 {dimension_numbers = #tpu.dot_dimension_numbers<[1], [0], [0], [1], [0, 0, 1, 1], [], []>} : vector<64x16xf32>, vector<16x32xf32>, vector<64x32xf32> -> vector<64x32xf32>
    %41 = arith.mulf %40, %2 : vector<64x32xf32>
    %42 = vector.extract_strided_slice %41 {offsets = [0, 0], sizes = [16, 32], strides = [1, 1]} : vector<64x32xf32> to vector<16x32xf32>
    %43 = vector.extract_strided_slice %41 {offsets = [16, 0], sizes = [16, 32], strides = [1, 1]} : vector<64x32xf32> to vector<16x32xf32>
    %44 = arith.addf %42, %43 : vector<16x32xf32>
    %45 = vector.extract_strided_slice %41 {offsets = [32, 0], sizes = [16, 32], strides = [1, 1]} : vector<64x32xf32> to vector<16x32xf32>
    %46 = arith.addf %44, %45 : vector<16x32xf32>
    %47 = vector.extract_strided_slice %41 {offsets = [48, 0], sizes = [16, 32], strides = [1, 1]} : vector<64x32xf32> to vector<16x32xf32>
    %48 = arith.addf %46, %47 : vector<16x32xf32>
    %c0_19 = arith.constant 0 : index
    %c0_20 = arith.constant 0 : index
    %c0_21 = arith.constant 0 : index
    %49 = vector.load %arg4[%c0_19, %c0_20, %c0_21] : memref<2x32x32xf32, #tpu.memory_space<vmem>>, vector<1x32x32xf32>
    %50 = vector.shape_cast %49 : vector<1x32x32xf32> to vector<32x32xf32>
    %cst_22 = arith.constant dense<0.000000e+00> : vector<16x32xf32>
    %51 = tpu.matmul %48, %50, %cst_22 {dimension_numbers = #tpu.dot_dimension_numbers<[1], [0], [0], [1], [0, 0, 1, 1], [], []>} : vector<16x32xf32>, vector<32x32xf32>, vector<16x32xf32> -> vector<16x32xf32>
    %52 = vector.broadcast %12 : vector<1x32xf32> to vector<16x32xf32>
    %53 = arith.addf %51, %52 : vector<16x32xf32>
    %54 = arith.addf %7, %53 : vector<16x32xf32>
    %cst_23 = arith.constant dense<0.000000e+00> : vector<16xf32>
    %55 = vector.multi_reduction <add>, %54, %cst_23 [1] : vector<16x32xf32> to vector<16xf32>
    %56 = vector.shape_cast %55 : vector<16xf32> to vector<16x1xf32>
    %cst_24 = arith.constant 3.200000e+01 : f32
    %57 = vector.broadcast %cst_24 : f32 to vector<16x1xf32>
    %58 = arith.divf %56, %57 : vector<16x1xf32>
    %59 = vector.broadcast %58 : vector<16x1xf32> to vector<16x32xf32>
    %60 = arith.subf %54, %59 : vector<16x32xf32>
    %61 = arith.mulf %60, %60 : vector<16x32xf32>
    %cst_25 = arith.constant dense<0.000000e+00> : vector<16xf32>
    %62 = vector.multi_reduction <add>, %61, %cst_25 [1] : vector<16x32xf32> to vector<16xf32>
    %63 = vector.shape_cast %62 : vector<16xf32> to vector<16x1xf32>
    %cst_26 = arith.constant 3.200000e+01 : f32
    %64 = vector.broadcast %cst_26 : f32 to vector<16x1xf32>
    %65 = arith.divf %63, %64 : vector<16x1xf32>
    %cst_27 = arith.constant 9.99999974E-6 : f32
    %66 = vector.broadcast %cst_27 : f32 to vector<16x1xf32>
    %67 = arith.addf %65, %66 : vector<16x1xf32>
    %68 = math.rsqrt %67 : vector<16x1xf32>
    %69 = vector.broadcast %68 : vector<16x1xf32> to vector<16x32xf32>
    %70 = arith.mulf %60, %69 : vector<16x32xf32>
    %71 = vector.broadcast %13 : vector<1x32xf32> to vector<16x32xf32>
    %72 = arith.mulf %70, %71 : vector<16x32xf32>
    %73 = vector.broadcast %14 : vector<1x32xf32> to vector<16x32xf32>
    %74 = arith.addf %72, %73 : vector<16x32xf32>
    %c0_28 = arith.constant 0 : index
    %c0_29 = arith.constant 0 : index
    %c0_30 = arith.constant 0 : index
    %75 = vector.load %arg5[%c0_28, %c0_29, %c0_30] : memref<2x32x64xf32, #tpu.memory_space<vmem>>, vector<1x32x64xf32>
    %76 = vector.shape_cast %75 : vector<1x32x64xf32> to vector<32x64xf32>
    %cst_31 = arith.constant dense<0.000000e+00> : vector<16x64xf32>
    %77 = tpu.matmul %74, %76, %cst_31 {dimension_numbers = #tpu.dot_dimension_numbers<[1], [0], [0], [1], [0, 0, 1, 1], [], []>} : vector<16x32xf32>, vector<32x64xf32>, vector<16x64xf32> -> vector<16x64xf32>
    %78 = vector.broadcast %11 : vector<1x64xf32> to vector<16x64xf32>
    %79 = arith.addf %77, %78 : vector<16x64xf32>
    %cst_32 = arith.constant 0.000000e+00 : f32
    %80 = vector.broadcast %cst_32 : f32 to vector<16x64xf32>
    %81 = arith.maximumf %79, %80 : vector<16x64xf32>
    %c0_33 = arith.constant 0 : index
    %c0_34 = arith.constant 0 : index
    %c0_35 = arith.constant 0 : index
    %82 = vector.load %arg6[%c0_33, %c0_34, %c0_35] : memref<2x64x32xf32, #tpu.memory_space<vmem>>, vector<1x64x32xf32>
    %83 = vector.shape_cast %82 : vector<1x64x32xf32> to vector<64x32xf32>
    %cst_36 = arith.constant dense<0.000000e+00> : vector<16x32xf32>
    %84 = tpu.matmul %81, %83, %cst_36 {dimension_numbers = #tpu.dot_dimension_numbers<[1], [0], [0], [1], [0, 0, 1, 1], [], []>} : vector<16x64xf32>, vector<64x32xf32>, vector<16x32xf32> -> vector<16x32xf32>
    %85 = vector.broadcast %15 : vector<1x32xf32> to vector<16x32xf32>
    %86 = arith.addf %84, %85 : vector<16x32xf32>
    %87 = arith.addf %74, %86 : vector<16x32xf32>
    %cst_37 = arith.constant dense<0.000000e+00> : vector<16xf32>
    %88 = vector.multi_reduction <add>, %87, %cst_37 [1] : vector<16x32xf32> to vector<16xf32>
    %89 = vector.shape_cast %88 : vector<16xf32> to vector<16x1xf32>
    %cst_38 = arith.constant 3.200000e+01 : f32
    %90 = vector.broadcast %cst_38 : f32 to vector<16x1xf32>
    %91 = arith.divf %89, %90 : vector<16x1xf32>
    %92 = vector.broadcast %91 : vector<16x1xf32> to vector<16x32xf32>
    %93 = arith.subf %87, %92 : vector<16x32xf32>
    %94 = arith.mulf %93, %93 : vector<16x32xf32>
    %cst_39 = arith.constant dense<0.000000e+00> : vector<16xf32>
    %95 = vector.multi_reduction <add>, %94, %cst_39 [1] : vector<16x32xf32> to vector<16xf32>
    %96 = vector.shape_cast %95 : vector<16xf32> to vector<16x1xf32>
    %cst_40 = arith.constant 3.200000e+01 : f32
    %97 = vector.broadcast %cst_40 : f32 to vector<16x1xf32>
    %98 = arith.divf %96, %97 : vector<16x1xf32>
    %cst_41 = arith.constant 9.99999974E-6 : f32
    %99 = vector.broadcast %cst_41 : f32 to vector<16x1xf32>
    %100 = arith.addf %98, %99 : vector<16x1xf32>
    %101 = math.rsqrt %100 : vector<16x1xf32>
    %102 = vector.broadcast %101 : vector<16x1xf32> to vector<16x32xf32>
    %103 = arith.mulf %93, %102 : vector<16x32xf32>
    %104 = vector.broadcast %16 : vector<1x32xf32> to vector<16x32xf32>
    %105 = arith.mulf %103, %104 : vector<16x32xf32>
    %106 = vector.broadcast %17 : vector<1x32xf32> to vector<16x32xf32>
    %107 = arith.addf %105, %106 : vector<16x32xf32>
    %c1 = arith.constant 1 : index
    %c0_42 = arith.constant 0 : index
    %c0_43 = arith.constant 0 : index
    %108 = vector.load %arg7[%c1, %c0_42, %c0_43] : memref<2x8x96xf32, #tpu.memory_space<vmem>>, vector<1x8x96xf32>
    %109 = vector.shape_cast %108 : vector<1x8x96xf32> to vector<8x96xf32>
    %110 = vector.extract_strided_slice %109 {offsets = [0, 0], sizes = [1, 96], strides = [1, 1]} : vector<8x96xf32> to vector<1x96xf32>
    %111 = vector.extract_strided_slice %109 {offsets = [1, 0], sizes = [1, 64], strides = [1, 1]} : vector<8x96xf32> to vector<1x64xf32>
    %112 = vector.extract_strided_slice %109 {offsets = [2, 0], sizes = [1, 32], strides = [1, 1]} : vector<8x96xf32> to vector<1x32xf32>
    %113 = vector.extract_strided_slice %109 {offsets = [3, 0], sizes = [1, 32], strides = [1, 1]} : vector<8x96xf32> to vector<1x32xf32>
    %114 = vector.extract_strided_slice %109 {offsets = [4, 0], sizes = [1, 32], strides = [1, 1]} : vector<8x96xf32> to vector<1x32xf32>
    %115 = vector.extract_strided_slice %109 {offsets = [5, 0], sizes = [1, 32], strides = [1, 1]} : vector<8x96xf32> to vector<1x32xf32>
    %116 = vector.extract_strided_slice %109 {offsets = [6, 0], sizes = [1, 32], strides = [1, 1]} : vector<8x96xf32> to vector<1x32xf32>
    %117 = vector.extract_strided_slice %109 {offsets = [7, 0], sizes = [1, 32], strides = [1, 1]} : vector<8x96xf32> to vector<1x32xf32>
    %c1_44 = arith.constant 1 : index
    %c0_45 = arith.constant 0 : index
    %c0_46 = arith.constant 0 : index
    %118 = vector.load %arg3[%c1_44, %c0_45, %c0_46] : memref<2x32x96xf32, #tpu.memory_space<vmem>>, vector<1x32x96xf32>
    %119 = vector.shape_cast %118 : vector<1x32x96xf32> to vector<32x96xf32>
    %cst_47 = arith.constant dense<0.000000e+00> : vector<16x96xf32>
    %120 = tpu.matmul %107, %119, %cst_47 {dimension_numbers = #tpu.dot_dimension_numbers<[1], [0], [0], [1], [0, 0, 1, 1], [], []>} : vector<16x32xf32>, vector<32x96xf32>, vector<16x96xf32> -> vector<16x96xf32>
    %121 = vector.broadcast %110 : vector<1x96xf32> to vector<16x96xf32>
    %122 = arith.addf %120, %121 : vector<16x96xf32>
    %123 = vector.extract_strided_slice %122 {offsets = [0, 0], sizes = [16, 32], strides = [1, 1]} : vector<16x96xf32> to vector<16x32xf32>
    %124 = vector.extract_strided_slice %122 {offsets = [0, 32], sizes = [16, 32], strides = [1, 1]} : vector<16x96xf32> to vector<16x32xf32>
    %125 = vector.extract_strided_slice %122 {offsets = [0, 64], sizes = [16, 32], strides = [1, 1]} : vector<16x96xf32> to vector<16x32xf32>
    %126 = tpu.concatenate %123, %123, %123, %123 in 0 : vector<16x32xf32>, vector<16x32xf32>, vector<16x32xf32>, vector<16x32xf32> -> vector<64x32xf32>
    %127 = arith.mulf %126, %2 : vector<64x32xf32>
    %cst_48 = arith.constant dense<0.000000e+00> : vector<64x16xf32>
    %128 = tpu.matmul %127, %124, %cst_48 {dimension_numbers = #tpu.dot_dimension_numbers<[1], [1], [0], [0], [0, 0, 1, 0], [], []>} : vector<64x32xf32>, vector<16x32xf32>, vector<64x16xf32> -> vector<64x16xf32>
    %129 = arith.addf %128, %3 : vector<64x16xf32>
    %cst_49 = arith.constant dense<0xFF800000> : vector<64xf32>
    %130 = vector.multi_reduction <maximumf>, %129, %cst_49 [1] : vector<64x16xf32> to vector<64xf32>
    %131 = vector.shape_cast %130 : vector<64xf32> to vector<64x1xf32>
    %132 = vector.broadcast %131 : vector<64x1xf32> to vector<64x16xf32>
    %133 = arith.subf %129, %132 : vector<64x16xf32>
    %134 = math.exp %133 : vector<64x16xf32>
    %cst_50 = arith.constant dense<0.000000e+00> : vector<64xf32>
    %135 = vector.multi_reduction <add>, %134, %cst_50 [1] : vector<64x16xf32> to vector<64xf32>
    %136 = vector.shape_cast %135 : vector<64xf32> to vector<64x1xf32>
    %137 = tpu.reciprocal %136 {approx = true} : vector<64x1xf32> -> vector<64x1xf32>
    %138 = vector.broadcast %137 : vector<64x1xf32> to vector<64x16xf32>
    %139 = arith.mulf %134, %138 : vector<64x16xf32>
    %cst_51 = arith.constant dense<0.000000e+00> : vector<64x32xf32>
    %140 = tpu.matmul %139, %125, %cst_51 {dimension_numbers = #tpu.dot_dimension_numbers<[1], [0], [0], [1], [0, 0, 1, 1], [], []>} : vector<64x16xf32>, vector<16x32xf32>, vector<64x32xf32> -> vector<64x32xf32>
    %141 = arith.mulf %140, %2 : vector<64x32xf32>
    %142 = vector.extract_strided_slice %141 {offsets = [0, 0], sizes = [16, 32], strides = [1, 1]} : vector<64x32xf32> to vector<16x32xf32>
    %143 = vector.extract_strided_slice %141 {offsets = [16, 0], sizes = [16, 32], strides = [1, 1]} : vector<64x32xf32> to vector<16x32xf32>
    %144 = arith.addf %142, %143 : vector<16x32xf32>
    %145 = vector.extract_strided_slice %141 {offsets = [32, 0], sizes = [16, 32], strides = [1, 1]} : vector<64x32xf32> to vector<16x32xf32>
    %146 = arith.addf %144, %145 : vector<16x32xf32>
    %147 = vector.extract_strided_slice %141 {offsets = [48, 0], sizes = [16, 32], strides = [1, 1]} : vector<64x32xf32> to vector<16x32xf32>
    %148 = arith.addf %146, %147 : vector<16x32xf32>
    %c1_52 = arith.constant 1 : index
    %c0_53 = arith.constant 0 : index
    %c0_54 = arith.constant 0 : index
    %149 = vector.load %arg4[%c1_52, %c0_53, %c0_54] : memref<2x32x32xf32, #tpu.memory_space<vmem>>, vector<1x32x32xf32>
    %150 = vector.shape_cast %149 : vector<1x32x32xf32> to vector<32x32xf32>
    %cst_55 = arith.constant dense<0.000000e+00> : vector<16x32xf32>
    %151 = tpu.matmul %148, %150, %cst_55 {dimension_numbers = #tpu.dot_dimension_numbers<[1], [0], [0], [1], [0, 0, 1, 1], [], []>} : vector<16x32xf32>, vector<32x32xf32>, vector<16x32xf32> -> vector<16x32xf32>
    %152 = vector.broadcast %112 : vector<1x32xf32> to vector<16x32xf32>
    %153 = arith.addf %151, %152 : vector<16x32xf32>
    %154 = arith.addf %107, %153 : vector<16x32xf32>
    %cst_56 = arith.constant dense<0.000000e+00> : vector<16xf32>
    %155 = vector.multi_reduction <add>, %154, %cst_56 [1] : vector<16x32xf32> to vector<16xf32>
    %156 = vector.shape_cast %155 : vector<16xf32> to vector<16x1xf32>
    %cst_57 = arith.constant 3.200000e+01 : f32
    %157 = vector.broadcast %cst_57 : f32 to vector<16x1xf32>
    %158 = arith.divf %156, %157 : vector<16x1xf32>
    %159 = vector.broadcast %158 : vector<16x1xf32> to vector<16x32xf32>
    %160 = arith.subf %154, %159 : vector<16x32xf32>
    %161 = arith.mulf %160, %160 : vector<16x32xf32>
    %cst_58 = arith.constant dense<0.000000e+00> : vector<16xf32>
    %162 = vector.multi_reduction <add>, %161, %cst_58 [1] : vector<16x32xf32> to vector<16xf32>
    %163 = vector.shape_cast %162 : vector<16xf32> to vector<16x1xf32>
    %cst_59 = arith.constant 3.200000e+01 : f32
    %164 = vector.broadcast %cst_59 : f32 to vector<16x1xf32>
    %165 = arith.divf %163, %164 : vector<16x1xf32>
    %cst_60 = arith.constant 9.99999974E-6 : f32
    %166 = vector.broadcast %cst_60 : f32 to vector<16x1xf32>
    %167 = arith.addf %165, %166 : vector<16x1xf32>
    %168 = math.rsqrt %167 : vector<16x1xf32>
    %169 = vector.broadcast %168 : vector<16x1xf32> to vector<16x32xf32>
    %170 = arith.mulf %160, %169 : vector<16x32xf32>
    %171 = vector.broadcast %113 : vector<1x32xf32> to vector<16x32xf32>
    %172 = arith.mulf %170, %171 : vector<16x32xf32>
    %173 = vector.broadcast %114 : vector<1x32xf32> to vector<16x32xf32>
    %174 = arith.addf %172, %173 : vector<16x32xf32>
    %c1_61 = arith.constant 1 : index
    %c0_62 = arith.constant 0 : index
    %c0_63 = arith.constant 0 : index
    %175 = vector.load %arg5[%c1_61, %c0_62, %c0_63] : memref<2x32x64xf32, #tpu.memory_space<vmem>>, vector<1x32x64xf32>
    %176 = vector.shape_cast %175 : vector<1x32x64xf32> to vector<32x64xf32>
    %cst_64 = arith.constant dense<0.000000e+00> : vector<16x64xf32>
    %177 = tpu.matmul %174, %176, %cst_64 {dimension_numbers = #tpu.dot_dimension_numbers<[1], [0], [0], [1], [0, 0, 1, 1], [], []>} : vector<16x32xf32>, vector<32x64xf32>, vector<16x64xf32> -> vector<16x64xf32>
    %178 = vector.broadcast %111 : vector<1x64xf32> to vector<16x64xf32>
    %179 = arith.addf %177, %178 : vector<16x64xf32>
    %cst_65 = arith.constant 0.000000e+00 : f32
    %180 = vector.broadcast %cst_65 : f32 to vector<16x64xf32>
    %181 = arith.maximumf %179, %180 : vector<16x64xf32>
    %c1_66 = arith.constant 1 : index
    %c0_67 = arith.constant 0 : index
    %c0_68 = arith.constant 0 : index
    %182 = vector.load %arg6[%c1_66, %c0_67, %c0_68] : memref<2x64x32xf32, #tpu.memory_space<vmem>>, vector<1x64x32xf32>
    %183 = vector.shape_cast %182 : vector<1x64x32xf32> to vector<64x32xf32>
    %cst_69 = arith.constant dense<0.000000e+00> : vector<16x32xf32>
    %184 = tpu.matmul %181, %183, %cst_69 {dimension_numbers = #tpu.dot_dimension_numbers<[1], [0], [0], [1], [0, 0, 1, 1], [], []>} : vector<16x64xf32>, vector<64x32xf32>, vector<16x32xf32> -> vector<16x32xf32>
    %185 = vector.broadcast %115 : vector<1x32xf32> to vector<16x32xf32>
    %186 = arith.addf %184, %185 : vector<16x32xf32>
    %187 = arith.addf %174, %186 : vector<16x32xf32>
    %cst_70 = arith.constant dense<0.000000e+00> : vector<16xf32>
    %188 = vector.multi_reduction <add>, %187, %cst_70 [1] : vector<16x32xf32> to vector<16xf32>
    %189 = vector.shape_cast %188 : vector<16xf32> to vector<16x1xf32>
    %cst_71 = arith.constant 3.200000e+01 : f32
    %190 = vector.broadcast %cst_71 : f32 to vector<16x1xf32>
    %191 = arith.divf %189, %190 : vector<16x1xf32>
    %192 = vector.broadcast %191 : vector<16x1xf32> to vector<16x32xf32>
    %193 = arith.subf %187, %192 : vector<16x32xf32>
    %194 = arith.mulf %193, %193 : vector<16x32xf32>
    %cst_72 = arith.constant dense<0.000000e+00> : vector<16xf32>
    %195 = vector.multi_reduction <add>, %194, %cst_72 [1] : vector<16x32xf32> to vector<16xf32>
    %196 = vector.shape_cast %195 : vector<16xf32> to vector<16x1xf32>
    %cst_73 = arith.constant 3.200000e+01 : f32
    %197 = vector.broadcast %cst_73 : f32 to vector<16x1xf32>
    %198 = arith.divf %196, %197 : vector<16x1xf32>
    %cst_74 = arith.constant 9.99999974E-6 : f32
    %199 = vector.broadcast %cst_74 : f32 to vector<16x1xf32>
    %200 = arith.addf %198, %199 : vector<16x1xf32>
    %201 = math.rsqrt %200 : vector<16x1xf32>
    %202 = vector.broadcast %201 : vector<16x1xf32> to vector<16x32xf32>
    %203 = arith.mulf %193, %202 : vector<16x32xf32>
    %204 = vector.broadcast %116 : vector<1x32xf32> to vector<16x32xf32>
    %205 = arith.mulf %203, %204 : vector<16x32xf32>
    %206 = vector.broadcast %117 : vector<1x32xf32> to vector<16x32xf32>
    %207 = arith.addf %205, %206 : vector<16x32xf32>
    %cst_75 = arith.constant dense<0.000000e+00> : vector<2x32xf32>
    %208 = tpu.matmul %4, %207, %cst_75 {dimension_numbers = #tpu.dot_dimension_numbers<[1], [0], [0], [1], [0, 0, 1, 1], [], []>} : vector<2x16xf32>, vector<16x32xf32>, vector<2x32xf32> -> vector<2x32xf32>
    %c0_76 = arith.constant 0 : index
    %c0_77 = arith.constant 0 : index
    %209 = vector.load %arg8[%c0_76, %c0_77] : memref<33x1xf32, #tpu.memory_space<vmem>>, vector<32x1xf32>
    %c32_78 = arith.constant 32 : index
    %c0_79 = arith.constant 0 : index
    %210 = vector.load %arg8[%c32_78, %c0_79] : memref<33x1xf32, #tpu.memory_space<vmem>>, vector<1x1xf32>
    %cst_80 = arith.constant dense<0.000000e+00> : vector<2x1xf32>
    %211 = tpu.matmul %208, %209, %cst_80 {dimension_numbers = #tpu.dot_dimension_numbers<[1], [0], [0], [1], [0, 0, 1, 1], [], []>} : vector<2x32xf32>, vector<32x1xf32>, vector<2x1xf32> -> vector<2x1xf32>
    %212 = vector.broadcast %210 : vector<1x1xf32> to vector<2x1xf32>
    %213 = arith.addf %211, %212 : vector<2x1xf32>
    %c0_81 = arith.constant 0 : index
    %c0_82 = arith.constant 0 : index
    %214 = vector.load %arg9[%c0_81, %c0_82] : memref<2x1xf32, #tpu.memory_space<vmem>>, vector<2x1xf32>
    tpu.vector_store %arg9[%c0_81, %c0_82], %213 {strides = array<i32>} : memref<2x1xf32, #tpu.memory_space<vmem>>, vector<2x1xf32>,
    return
  }
}

</mosaic_0001>

<bundles_post_ra>
// kernel: tpu_custom_call.1
= control target key start
LH: loop header
LB: loop body
LE: loop exit
PB: predicated region body
PF: predicated region fallthrough
CT: control target
= control target key end

     0   :  { %vm55_vm0 = vcmask 130048   ;;  %vm146_vm1 = vcmask 261120   ;;  %v142_v14 = vlaneseq  ;;  %s2431_s11 = smov 96   ;;  %s2432_s21 = smov 64   ;;  %vm845_vm2 = vcmask 523264   ;;  %s3026_s1 = inlined_call_operand.vmem [shape: f32[96,32], index: 1, kind: input, shape index: {}]   ;;  %s3027_s0 = inlined_call_operand.vmem [shape: f32[16,16], index: 0, kind: input, shape index: {}]   ;;  %s3028_s3 = inlined_call_operand.vmem [shape: f32[2,32,96], index: 3, kind: input, shape index: {}]   ;;  %s3029_s7 = inlined_call_operand.vmem [shape: f32[2,8,96], index: 7, kind: input, shape index: {}]   ;;  %s3030_s2 = inlined_call_operand.vmem [shape: f32[66,16], index: 2, kind: input, shape index: {}]   ;;  %s3031_s4 = inlined_call_operand.vmem [shape: f32[2,32,32], index: 4, kind: input, shape index: {}]   ;;  %s3032_s5 = inlined_call_operand.vmem [shape: f32[2,32,64], index: 5, kind: input, shape index: {}]   ;;  %s3033_s6 = inlined_call_operand.vmem [shape: f32[2,64,32], index: 6, kind: input, shape index: {}]   ;;  %s3034_s8 = inlined_call_operand.vmem [shape: f32[33,1], index: 8, kind: input, shape index: {}]   ;;  %s3035_s9 = inlined_call_operand.vmem [shape: f32[2,1], index: 9, kind: output, shape index: {}]  }
   0x1   :  { %v33_v0 = vld [vmem:[%s3026_s1 + $0x8] sm:$0xff]  ;;  %v32_v1 = vld [vmem:[%s3026_s1] sm:$0xff]  ;;  %v141_v3 = vld [vmem:[%s3028_s3 + $0x18] sm:$0xff]  ;;  %vm2434_vm3 = vmmov 0   ;;  %vm1954_vm4 = vcmask 1024  }
   0x2   :  { %v53_v2 = vld [vmem:[%s3027_s0] sm:$0xff]  ;;  %2146 = vmatprep.subr.mxu0 %v33_v0  ;;  %v54_v4 = vld [vmem:[%s3027_s0 + $0x8] sm:$0xff]  ;;  %2153 = vmatprep.subr.mxu1 %v141_v3  ;;  %v140_v5 = vld [vmem:[%s3028_s3 + $0x10] sm:$0xff]  ;;  %v2525_v15 = vshrl.u32 %v142_v14, 7 }
   0x3   :  { %2150 = vmatprep.mubr.msk.f32.mxu0 %vm55_vm0, %v53_v2  ;;  %2147 = vmatpush3.msra.mxu0 %v33_v0  ;;  %v139_v6 = vld [vmem:[%s3028_s3 + $0x8] sm:$0xff]  ;;  %v138_v7 = vld [vmem:[%s3028_s3] sm:$0xff]  ;;  %v34_v9 = vld [vmem:[%s3026_s1 + $0x10] sm:$0xff] }
   0x4   :  { %2148 = vmatprep.subr.mxu0 %v32_v1  ;;  %2154 = vmatpush3.msra.mxu1 %v141_v3  ;;  %v35_v10 = vld [vmem:[%s3026_s1 + $0x18] sm:$0xff]  ;;  %v144_v16 = vsub.s32 0, %v2525_v15  ;;  %v2531_v17 = vld [vmem:[%s3029_s7] sm:$0xff]  ;;  %v2557_v27 = vld [vmem:[%s3026_s1 + $0x28] sm:$0xff] }
   0x5   :  { %2149 = vmatpush3.msra.mxu0 %v32_v1  ;;  %2155 = vmatprep.subr.mxu1 %v140_v5  ;;  %v2541_v22 = vld [vmem:[%s3026_s1 + $0x20] sm:$0xff]  ;;  %v2563_v28 = vld [vmem:[%s3026_s1 + $0x30] sm:$0xff]  ;;  %v2573_v31 = vld [vmem:[%s3026_s1 + $0x38] sm:$0xff] }
   0x6   :  { %2151 = vmatmul.mubr.msk.f32.vlgmr.msra.gmra.mxu0 %vm55_vm0, %v54_v4  ;;  %2156 = vmatpush3.msra.mxu1 %v140_v5  ;;  %v145_v18 = vrot.slane %v2531_v17, %v144_v16  ;;  %v2579_v32 = vld [vmem:[%s3026_s1 + $0x40] sm:$0xff]  ;;  %v2589_v35 = vld [vmem:[%s3026_s1 + $0x48] sm:$0xff]  ;;  %v2595_v36 = vld [vmem:[%s3026_s1 + $0x50] sm:$0xff] }
   0x7   :  { %2157 = vmatprep.subr.mxu1 %v139_v6  ;;  %v2605_v39 = vld [vmem:[%s3026_s1 + $0x58] sm:$0xff]  ;;  %v2615_v41 = vld [vmem:[%s3030_s2 + $0x8] sm:$0xff]  ;;  %v2620_v43 = vld [vmem:[%s3030_s2] sm:$0xff] }
   0x8   :  { %2158 = vmatpush3.msra.mxu1 %v139_v6  ;;  %v2628_v48 = vld [vmem:[%s3030_s2 + $0x18] sm:$0xff]  ;;  %v2633_v50 = vld [vmem:[%s3030_s2 + $0x10] sm:$0xff]  ;;  %v2641_v55 = vld [vmem:[%s3030_s2 + $0x28] sm:$0xff] }
   0x9   :  { %2159 = vmatprep.subr.mxu1 %v138_v7  ;;  %v2649_v61 = vld [vmem:[%s3030_s2 + $0x20] sm:$0xff]  ;;  %v2656_v2 = vld [vmem:[%s3030_s2 + $0x30] sm:$0xff]  ;;  %v2663_v5 = vld [vmem:[%s3030_s2 + $0x38] sm:$0xff] }
   0xa   :  { %2160 = vmatpush3.msra.mxu1 %v138_v7 }
  0xc6   :  { %v2152_v8 = vpop.f32.mrf.mxu0 }
  0xc7   :  { %v2519_v13 = vadd.f32 %v2152_v8, %v35_v10 }
  0xc8   :  { %v128_v11 = vpop.f32.mrf.mxu0 }
  0xc9   :  { %v2517_v12 = vadd.f32 %v128_v11, %v34_v9 }
  0xcb   :  { %2161 = vmatprep.mubr.msk.f32.mxu1 %vm146_vm1, %v2517_v12 }
  0xcc   :  { %2162 = vmatmul.mubr.msk.f32.vlgmr.msra.gmra.mxu1 %vm146_vm1, %v2519_v13 }
 0x18c   :  { %v2163_v19 = vpop.f32.mrf.mxu1 }
 0x18d   :  { %v2536_v20 = vadd.f32 %v2163_v19, %v145_v18 }
 0x18e   :  { %v219_v21 = vpop.f32.mrf.mxu1 }
 0x18f   :  { %v2543_v23 = vadd.f32 %v219_v21, %v145_v18  ;;  %240 = vrot.lane.b32.xlu0 %v2536_v20, %s2431_s11  ;;  %v229_v29 = vmul.f32 %v2536_v20, %v2557_v27  ;;  %v231_v33 = vmul.f32 %v2536_v20, %v2573_v31  ;;  %v233_v37 = vmul.f32 %v2536_v20, %v2589_v35 }
 0x190   :  { %v235_v40 = vmul.f32 %v2536_v20, %v2605_v39 }
 0x191   :  { %v228_v24 = vmul.f32 %v2543_v23, %v2541_v22  ;;  %v230_v30 = vmul.f32 %v2543_v23, %v2563_v28  ;;  %v232_v34 = vmul.f32 %v2543_v23, %v2579_v32  ;;  %v234_v38 = vmul.f32 %v2543_v23, %v2595_v36 }
 0x193   :  { %238 = vrot.lane.b32.xlu0 %v2543_v23, %s2431_s11  ;;  %2168 = vmatprep.mubr.msk.f32.mxu0 %vm146_vm1, %v228_v24 }
 0x201   :  { %v241_v25 = vpop.permute.xlu0 %240 }
 0x202   :  { %2164 = vmatprep.subr.msk.mxu0 %vm146_vm1, %v241_v25 }
 0x203   :  { %2165 = vmatpush3.xpose.msk.msra.mxu0 %vm146_vm1, %v241_v25 }
 0x205   :  { %v239_v26 = vpop.permute.xlu0 %238 }
 0x206   :  { %2166 = vmatprep.subr.msk.mxu0 %vm146_vm1, %v239_v26 }
 0x207   :  { %2167 = vmatpush3.xpose.msk.msra.mxu0 %vm146_vm1, %v239_v26 }
 0x20a   :  { %2169 = vmatmul.mubr.msk.f32.vlgmr.msra.gmra.mxu0 %vm146_vm1, %v229_v29 }
 0x20b   :  { %2171 = vmatprep.mubr.msk.f32.mxu0 %vm146_vm1, %v230_v30 }
 0x20e   :  { %2172 = vmatmul.mubr.msk.f32.gmra.mxu0 %vm146_vm1, %v231_v33 }
 0x20f   :  { %2174 = vmatprep.mubr.msk.f32.mxu0 %vm146_vm1, %v232_v34 }
 0x212   :  { %2175 = vmatmul.mubr.msk.f32.gmra.mxu0 %vm146_vm1, %v233_v37 }
 0x213   :  { %2177 = vmatprep.mubr.msk.f32.mxu0 %vm146_vm1, %v234_v38 }
 0x216   :  { %2178 = vmatmul.mubr.msk.f32.gmra.mxu0 %vm146_vm1, %v235_v40 }
 0x2ca   :  { %v2170_v42 = vpop.f32.mrf.mxu0 }
 0x2cb   :  { %v342_v44 = vadd.f32 %v2170_v42, %v2615_v41 }
 0x2cc   :  { %v336_v45 = vpop.f32.mrf.mxu0 }
 0x2cd   :  { %v337_v46 = vadd.f32 %v336_v45, %v2620_v43  ;;  %v378_v47 = vsel %vm55_vm0, %v342_v44, -inf }
 0x2ce   :  { %379 = vmax.xlane.f32.xlu1 %v378_v47  ;;  %v2173_v49 = vpop.f32.mrf.mxu0 }
 0x2cf   :  { %v352_v52 = vadd.f32 %v2173_v49, %v2628_v48  ;;  %v375_v54 = vsel %vm55_vm0, %v337_v46, -inf }
 0x2d0   :  { %v346_v51 = vpop.f32.mrf.mxu0 }
 0x2d1   :  { %v347_v53 = vadd.f32 %v346_v51, %v2633_v50  ;;  %v384_v60 = vsel %vm55_vm0, %v352_v52, -inf }
 0x2d2   :  { %v2176_v56 = vpop.f32.mrf.mxu0  ;;  %376 = vmax.xlane.f32.xlu1 %v375_v54 }
 0x2d3   :  { %v381_v57 = vsel %vm55_vm0, %v347_v53, -inf  ;;  %v362_v59 = vadd.f32 %v2176_v56, %v2641_v55 }
 0x2d4   :  { %v356_v58 = vpop.f32.mrf.mxu0  ;;  %382 = vmax.xlane.f32.xlu0 %v381_v57 }
 0x2d5   :  { %v357_v63 = vadd.f32 %v356_v58, %v2649_v61  ;;  %v390_v0 = vsel %vm55_vm0, %v362_v59, -inf }
 0x2d6   :  { %v2179_v62 = vpop.f32.mrf.mxu0  ;;  %385 = vmax.xlane.f32.xlu1 %v384_v60 }
 0x2d7   :  { %v387_v4 = vsel %vm55_vm0, %v357_v63, -inf  ;;  %v372_v6 = vadd.f32 %v2179_v62, %v2663_v5 }
 0x2d8   :  { %v366_v1 = vpop.f32.mrf.mxu0 }
 0x2d9   :  { %v367_v3 = vadd.f32 %v366_v1, %v2656_v2  ;;  %v396_v8 = vsel %vm55_vm0, %v372_v6, -inf }
 0x2da   :  { %391 = vmax.xlane.f32.xlu1 %v390_v0 }
 0x2db   :  { %v393_v7 = vsel %vm55_vm0, %v367_v3, -inf }
 0x2de   :  { %388 = vmax.xlane.f32.xlu1 %v387_v4 }
 0x2e2   :  { %394 = vmax.xlane.f32.xlu1 %v393_v7 }
 0x2e6   :  { %397 = vmax.xlane.f32.xlu1 %v396_v8 }
 0x357   :  { %v380_v9 = vpop.xlane.xlu1 %379 }
 0x358   :  { %v400_v10 = vsub.f32 %v342_v44, %v380_v9 }
 0x35a   :  { %v409_v11 = vmul.f32 1.442695, %v400_v10 }
 0x35b   :  { %v377_v14 = vpop.xlane.xlu1 %376 }
 0x35c   :  { %2343 = vpow2.f32 %v409_v11  ;;  %v399_v18 = vsub.f32 %v337_v46, %v377_v14 }
 0x35d   :  { %v383_v19 = vpop.xlane.xlu0 %382 }
 0x35e   :  { %v407_v21 = vmul.f32 1.442695, %v399_v18  ;;  %v401_v24 = vsub.f32 %v347_v53, %v383_v19 }
 0x35f   :  { %v386_v25 = vpop.xlane.xlu1 %385 }
 0x360   :  { %2345 = vpow2.f32 %v407_v21  ;;  %v411_v26 = vmul.f32 1.442695, %v401_v24  ;;  %v402_v29 = vsub.f32 %v352_v52, %v386_v25 }
 0x362   :  { %2347 = vpow2.f32 %v411_v26  ;;  %v413_v30 = vmul.f32 1.442695, %v402_v29 }
 0x363   :  { %v392_v33 = vpop.xlane.xlu1 %391 }
 0x364   :  { %2349 = vpow2.f32 %v413_v30  ;;  %v404_v34 = vsub.f32 %v362_v59, %v392_v33 }
 0x366   :  { %v417_v37 = vmul.f32 1.442695, %v404_v34 }
 0x367   :  { %v389_v38 = vpop.xlane.xlu1 %388 }
 0x368   :  { %2351 = vpow2.f32 %v417_v37  ;;  %v403_v40 = vsub.f32 %v357_v63, %v389_v38 }
 0x369   :  { %v2668_v42 = vpop.eup %2343 }
 0x36a   :  { %v415_v44 = vmul.f32 1.442695, %v403_v40  ;;  %v426_v45 = vsel %vm55_vm0, %v2668_v42, 0.0 }
 0x36b   :  { %427 = vadd.xlane.f32.xlu1 %v426_v45  ;;  %v395_v46 = vpop.xlane.xlu1 %394 }
 0x36c   :  { %2353 = vpow2.f32 %v415_v44  ;;  %v405_v47 = vsub.f32 %v367_v3, %v395_v46 }
 0x36d   :  { %v2346_v49 = vpop.eup %2345 }
 0x36e   :  { %v419_v51 = vmul.f32 1.442695, %v405_v47  ;;  %v423_v52 = vsel %vm55_vm0, %v2346_v49, 0.0 }
 0x36f   :  { %v2348_v53 = vpop.eup %2347  ;;  %424 = vadd.xlane.f32.xlu1 %v423_v52  ;;  %v398_v54 = vpop.xlane.xlu1 %397  ;;  %v614_v52 = vld [vmem:[%s3031_s4 + $0x10] sm:$0xff] }
 0x370   :  { %2355 = vpow2.f32 %v419_v51  ;;  %v406_v56 = vsub.f32 %v372_v6, %v398_v54  ;;  %v429_v59 = vsel %vm55_vm0, %v2348_v53, 0.0  ;;  %v615_v51 = vld [vmem:[%s3031_s4 + $0x18] sm:$0xff]  ;;  %v612_v54 = vld [vmem:[%s3031_s4] sm:$0xff] }
 0x371   :  { %v2350_v57 = vpop.eup %2349  ;;  %2196 = vmatprep.subr.mxu0 %v615_v51 }
 0x372   :  { %v421_v58 = vmul.f32 1.442695, %v406_v56  ;;  %v432_v60 = vsel %vm55_vm0, %v2350_v57, 0.0  ;;  %2197 = vmatpush3.msra.mxu0 %v615_v51 }
 0x373   :  { %430 = vadd.xlane.f32.xlu1 %v429_v59  ;;  %433 = vadd.xlane.f32.xlu0 %v432_v60 }
 0x374   :  { %2357 = vpow2.f32 %v421_v58  ;;  %2198 = vmatprep.subr.mxu0 %v614_v52 }
 0x375   :  { %v2352_v62 = vpop.eup %2351  ;;  %2199 = vmatpush3.msra.mxu0 %v614_v52 }
 0x376   :  { %v438_v63 = vsel %vm55_vm0, %v2352_v62, 0.0 }
 0x377   :  { %439 = vadd.xlane.f32.xlu0 %v438_v63 }
 0x379   :  { %v2354_v0 = vpop.eup %2353 }
 0x37a   :  { %v435_v1 = vsel %vm55_vm0, %v2354_v0, 0.0 }
 0x37b   :  { %436 = vadd.xlane.f32.xlu1 %v435_v1 }
 0x37d   :  { %v2356_v3 = vpop.eup %2355 }
 0x37e   :  { %v441_v4 = vsel %vm55_vm0, %v2356_v3, 0.0 }
 0x37f   :  { %442 = vadd.xlane.f32.xlu1 %v441_v4 }
 0x381   :  { %v2358_v6 = vpop.eup %2357 }
 0x382   :  { %v444_v7 = vsel %vm55_vm0, %v2358_v6, 0.0 }
 0x383   :  { %445 = vadd.xlane.f32.xlu0 %v444_v7 }
 0x390   :  { %465 = vrot.lane.b32.xlu1 %v2536_v20, %s2432_s21 }
 0x399   :  { %463 = vrot.lane.b32.xlu0 %v2543_v23, %s2432_s21 }
 0x3f4   :  { %v428_v8 = vpop.xlane.xlu1 %427 }
 0x3f8   :  { %v425_v9 = vpop.xlane.xlu1 %424 }
 0x3f9   :  { %2359 = vrcp.f32 %v425_v9 }
 0x3fa   :  { %2361 = vrcp.f32 %v428_v8 }
 0x3fc   :  { %v431_v10 = vpop.xlane.xlu1 %430  ;;  %v434_v11 = vpop.xlane.xlu0 %433 }
 0x3fd   :  { %2363 = vrcp.f32 %v431_v10 }
 0x3fe   :  { %2365 = vrcp.f32 %v434_v11 }
 0x400   :  { %v440_v19 = vpop.xlane.xlu0 %439 }
 0x404   :  { %v437_v14 = vpop.xlane.xlu1 %436 }
 0x405   :  { %2367 = vrcp.f32 %v437_v14 }
 0x406   :  { %v2360_v18 = vpop.eup %2359  ;;  %2369 = vrcp.f32 %v440_v19 }
 0x407   :  { %v455_v21 = vmul.f32 %v2360_v18, %v2346_v49  ;;  %v2362_v25 = vpop.eup %2361 }
 0x408   :  { %v443_v24 = vpop.xlane.xlu1 %442  ;;  %v456_v30 = vmul.f32 %v2362_v25, %v2668_v42 }
 0x409   :  { %2184 = vmatprep.mubr.msk.f32.mxu1 %vm55_vm0, %v455_v21  ;;  %2371 = vrcp.f32 %v443_v24 }
 0x40a   :  { %v2364_v26 = vpop.eup %2363 }
 0x40b   :  { %v2366_v33 = vpop.eup %2365  ;;  %v457_v34 = vmul.f32 %v2364_v26, %v2348_v53  ;;  %v613_v53 = vld [vmem:[%s3031_s4 + $0x8] sm:$0xff] }
 0x40c   :  { %v446_v20 = vpop.xlane.xlu0 %445  ;;  %v466_v23 = vpop.permute.xlu1 %465  ;;  %v458_v38 = vmul.f32 %v2366_v33, %v2350_v57  ;;  %2200 = vmatprep.subr.mxu0 %v613_v53 }
 0x40d   :  { %2373 = vrcp.f32 %v446_v20  ;;  %2180 = vmatprep.subr.mxu1 %v466_v23  ;;  %2201 = vmatpush3.msra.mxu0 %v613_v53  ;;  %v618_v20 = vsub.s32 2, %v2525_v15  ;;  %v744_v53 = vld [vmem:[%s3032_s5 + $0x10] sm:$0xff] }
 0x40e   :  { %2181 = vmatpush3.msra.mxu1 %v466_v23  ;;  %2202 = vmatprep.subr.mxu0 %v612_v54 }
 0x40f   :  { %2203 = vmatpush3.msra.mxu0 %v612_v54  ;;  %v619_v23 = vrot.slane %v2531_v17, %v618_v20  ;;  %v743_v54 = vld [vmem:[%s3032_s5 + $0x8] sm:$0xff] }
 0x410   :  { %v464_v29 = vpop.permute.xlu0 %463 }
 0x411   :  { %2182 = vmatprep.subr.mxu1 %v464_v29 }
 0x412   :  { %2183 = vmatpush3.msra.mxu1 %v464_v29  ;;  %v2368_v37 = vpop.eup %2367 }
 0x413   :  { %2185 = vmatmul.mubr.msk.f32.vlgmr.msra.gmra.mxu1 %vm55_vm0, %v456_v30  ;;  %v2370_v40 = vpop.eup %2369  ;;  %v459_v44 = vmul.f32 %v2368_v37, %v2354_v0 }
 0x414   :  { %2187 = vmatprep.mubr.msk.f32.mxu1 %vm55_vm0, %v457_v34  ;;  %v460_v46 = vmul.f32 %v2370_v40, %v2352_v62 }
 0x416   :  { %v2372_v45 = vpop.eup %2371 }
 0x417   :  { %2188 = vmatmul.mubr.msk.f32.gmra.mxu1 %vm55_vm0, %v458_v38  ;;  %v461_v49 = vmul.f32 %v2372_v45, %v2356_v3 }
 0x418   :  { %2190 = vmatprep.mubr.msk.f32.mxu1 %vm55_vm0, %v459_v44 }
 0x41a   :  { %v2374_v47 = vpop.eup %2373 }
 0x41b   :  { %2191 = vmatmul.mubr.msk.f32.gmra.mxu1 %vm55_vm0, %v460_v46  ;;  %v462_v42 = vmul.f32 %v2374_v47, %v2358_v6 }
 0x41c   :  { %2193 = vmatprep.mubr.msk.f32.mxu1 %vm55_vm0, %v461_v49 }
 0x41f   :  { %2194 = vmatmul.mubr.msk.f32.gmra.mxu1 %vm55_vm0, %v462_v42 }
 0x4d3   :  { %v2186_v56 = vpop.f32.mrf.mxu1 }
 0x4d4   :  { %v599_v4 = vmul.f32 %v2186_v56, %v2557_v27  ;;  %v742_v56 = vld [vmem:[%s3032_s5] sm:$0xff] }
 0x4d5   :  { %v559_v57 = vpop.f32.mrf.mxu1 }
 0x4d6   :  { %v598_v1 = vmul.f32 %v559_v57, %v2541_v22  ;;  %v840_v57 = vld [vmem:[%s3033_s6 + $0x38] sm:$0xff] }
 0x4d7   :  { %v2189_v58 = vpop.f32.mrf.mxu1  ;;  %2218 = vmatprep.subr.mxu0 %v840_v57 }
 0x4d8   :  { %v601_v63 = vmul.f32 %v2189_v58, %v2573_v31  ;;  %v839_v58 = vld [vmem:[%s3033_s6 + $0x30] sm:$0xff] }
 0x4d9   :  { %v569_v59 = vpop.f32.mrf.mxu1 }
 0x4da   :  { %v600_v62 = vmul.f32 %v569_v59, %v2563_v28  ;;  %v607_v9 = vadd.f32 %v601_v63, %v599_v4  ;;  %v838_v59 = vld [vmem:[%s3033_s6 + $0x28] sm:$0xff] }
 0x4db   :  { %v2192_v60 = vpop.f32.mrf.mxu1 }
 0x4dc   :  { %v603_v6 = vmul.f32 %v2192_v60, %v2589_v35  ;;  %v606_v8 = vadd.f32 %v600_v62, %v598_v1  ;;  %v837_v60 = vld [vmem:[%s3033_s6 + $0x20] sm:$0xff] }
 0x4dd   :  { %v579_v0 = vpop.f32.mrf.mxu1 }
 0x4de   :  { %v602_v3 = vmul.f32 %v579_v0, %v2579_v32  ;;  %v609_v19 = vadd.f32 %v607_v9, %v603_v6  ;;  %v732_v6 = vsub.s32 3, %v2525_v15  ;;  %v738_v9 = vsub.s32 4, %v2525_v15 }
 0x4df   :  { %v2195_v7 = vpop.f32.mrf.mxu1 }
 0x4e0   :  { %v605_v10 = vmul.f32 %v2195_v7, %v2605_v39  ;;  %v608_v14 = vadd.f32 %v606_v8, %v602_v3  ;;  %v733_v8 = vrot.slane %v2531_v17, %v732_v6 }
 0x4e1   :  { %v589_v11 = vpop.f32.mrf.mxu1 }
 0x4e2   :  { %v604_v18 = vmul.f32 %v589_v11, %v2595_v36  ;;  %v611_v24 = vadd.f32 %v609_v19, %v605_v10  ;;  %v739_v19 = vrot.slane %v2531_v17, %v738_v9 }
 0x4e4   :  { %v610_v21 = vadd.f32 %v608_v14, %v604_v18 }
 0x4e6   :  { %2204 = vmatprep.mubr.msk.f32.mxu0 %vm146_vm1, %v610_v21 }
 0x4e7   :  { %2205 = vmatmul.mubr.msk.f32.vlgmr.msra.gmra.mxu0 %vm146_vm1, %v611_v24 }
 0x4e8   :  { %2219 = vmatpush3.msra.mxu0 %v840_v57 }
 0x4e9   :  { %2220 = vmatprep.subr.mxu0 %v839_v58 }
 0x4ea   :  { %2221 = vmatpush3.msra.mxu0 %v839_v58 }
 0x4eb   :  { %2222 = vmatprep.subr.mxu0 %v838_v59 }
 0x4ec   :  { %2223 = vmatpush3.msra.mxu0 %v838_v59 }
 0x4ed   :  { %2224 = vmatprep.subr.mxu0 %v837_v60 }
 0x4ee   :  { %2225 = vmatpush3.msra.mxu0 %v837_v60 }
 0x5a7   :  { %v2206_v25 = vpop.f32.mrf.mxu0 }
 0x5a8   :  { %v698_v26 = vadd.f32 %v2206_v25, %v619_v23  ;;  %v836_v25 = vld [vmem:[%s3033_s6 + $0x18] sm:$0xff] }
 0x5a9   :  { %v692_v29 = vpop.f32.mrf.mxu0  ;;  %2226 = vmatprep.subr.mxu0 %v836_v25 }
 0x5aa   :  { %v693_v30 = vadd.f32 %v692_v29, %v619_v23  ;;  %v702_v33 = vadd.f32 %v698_v26, %v2519_v13  ;;  %2227 = vmatpush3.msra.mxu0 %v836_v25  ;;  %v835_v26 = vld [vmem:[%s3033_s6 + $0x10] sm:$0xff]  ;;  %v834_v29 = vld [vmem:[%s3033_s6 + $0x8] sm:$0xff]  ;;  %v957_v25 = vsub.s32 6, %v2525_v15 }
 0x5ab   :  { %2228 = vmatprep.subr.mxu0 %v835_v26 }
 0x5ac   :  { %v706_v34 = vsel %vm146_vm1, %v702_v33, 0.0  ;;  %v701_v37 = vadd.f32 %v693_v30, %v2517_v12  ;;  %v745_v12 = vld [vmem:[%s3032_s5 + $0x18] sm:$0xff]  ;;  %2229 = vmatpush3.msra.mxu0 %v835_v26  ;;  %v833_v30 = vld [vmem:[%s3033_s6] sm:$0xff] }
 0x5ad   :  { %707 = vadd.xlane.f32.xlu0 %v706_v34  ;;  %2207 = vmatprep.subr.mxu1 %v745_v12 }
 0x5ae   :  { %v703_v38 = vsel %vm146_vm1, %v701_v37, 0.0  ;;  %2208 = vmatpush3.msra.mxu1 %v745_v12  ;;  %2230 = vmatprep.subr.mxu0 %v834_v29 }
 0x5af   :  { %704 = vadd.xlane.f32.xlu1 %v703_v38  ;;  %2209 = vmatprep.subr.mxu1 %v744_v53 }
 0x5b0   :  { %2210 = vmatpush3.msra.mxu1 %v744_v53  ;;  %2231 = vmatpush3.msra.mxu0 %v834_v29  ;;  %v958_v29 = vrot.slane %v2531_v17, %v957_v25 }
 0x5b1   :  { %2211 = vmatprep.subr.mxu1 %v743_v54  ;;  %2232 = vmatprep.subr.mxu0 %v833_v30 }
 0x5b2   :  { %2212 = vmatpush3.msra.mxu1 %v743_v54  ;;  %2233 = vmatpush3.msra.mxu0 %v833_v30  ;;  %v963_v30 = vsub.s32 7, %v2525_v15 }
 0x5b3   :  { %2213 = vmatprep.subr.mxu1 %v742_v56 }
 0x5b4   :  { %2214 = vmatpush3.msra.mxu1 %v742_v56 }
 0x636   :  { %v708_v40 = vpop.xlane.xlu0 %707 }
 0x637   :  { %v711_v44 = vmul.f32 0.03125, %v708_v40 }
 0x638   :  { %v705_v45 = vpop.xlane.xlu1 %704 }
 0x639   :  { %v713_v46 = vsub.f32 %v702_v33, %v711_v44  ;;  %v710_v47 = vmul.f32 0.03125, %v705_v45  ;;  %v748_v33 = vsub.s32 1, %v2525_v15 }
 0x63b   :  { %v712_v49 = vsub.f32 %v701_v37, %v710_v47  ;;  %v715_v42 = vmul.f32 %v713_v46, %v713_v46  ;;  %v749_v34 = vrot.slane %v2531_v17, %v748_v33  ;;  %v843_v47 = vsub.s32 5, %v2525_v15  ;;  %v1874_v15 = vld [vmem:[%s3034_s8 + $0x10] sm:$0xff] }
 0x63d   :  { %v719_v51 = vsel %vm146_vm1, %v715_v42, 0.0  ;;  %v714_v52 = vmul.f32 %v712_v49, %v712_v49 }
 0x63e   :  { %720 = vadd.xlane.f32.xlu0 %v719_v51 }
 0x63f   :  { %v716_v13 = vsel %vm146_vm1, %v714_v52, 0.0 }
 0x640   :  { %717 = vadd.xlane.f32.xlu1 %v716_v13 }
 0x6c7   :  { %v721_v62 = vpop.xlane.xlu0 %720 }
 0x6c8   :  { %v723_v63 = vmul.f32 0.03125, %v721_v62 }
 0x6c9   :  { %v718_v0 = vpop.xlane.xlu1 %717 }
 0x6ca   :  { %v725_v1 = vadd.f32 1e-05, %v723_v63  ;;  %v722_v3 = vmul.f32 0.03125, %v718_v0 }
 0x6cc   :  { %2375 = vrsqrt.f32 %v725_v1  ;;  %v724_v4 = vadd.f32 1e-05, %v722_v3 }
 0x6ce   :  { %2377 = vrsqrt.f32 %v724_v4 }
 0x6d9   :  { %v2376_v7 = vpop.eup %2375 }
 0x6da   :  { %v729_v10 = vmul.f32 %v2376_v7, %v713_v46  ;;  %v1992_v7 = vld [vmem:[%s3028_s3 + $0x38] sm:$0xff] }
 0x6db   :  { %v2378_v11 = vpop.eup %2377  ;;  %2237 = vmatprep.subr.mxu1 %v1992_v7 }
 0x6dc   :  { %v728_v14 = vmul.f32 %v2378_v11, %v712_v49  ;;  %v735_v18 = vmul.f32 %v733_v8, %v729_v10  ;;  %v844_v49 = vrot.slane %v2531_v17, %v843_v47  ;;  %v1990_v10 = vld [vmem:[%s3028_s3 + $0x28] sm:$0xff]  ;;  %v1989_v11 = vld [vmem:[%s3028_s3 + $0x20] sm:$0xff] }
 0x6de   :  { %v734_v21 = vmul.f32 %v733_v8, %v728_v14  ;;  %v741_v23 = vadd.f32 %v739_v19, %v735_v18  ;;  %v1991_v8 = vld [vmem:[%s3028_s3 + $0x30] sm:$0xff] }
 0x6e0   :  { %v740_v24 = vadd.f32 %v739_v19, %v734_v21 }
 0x6e2   :  { %2215 = vmatprep.mubr.msk.f32.mxu1 %vm146_vm1, %v740_v24 }
 0x6e3   :  { %2216 = vmatmul.mubr.msk.f32.vlgmr.msra.gmra.mxu1 %vm146_vm1, %v741_v23 }
 0x6e4   :  { %2238 = vmatpush3.msra.mxu1 %v1992_v7 }
 0x6e5   :  { %2239 = vmatprep.subr.mxu1 %v1991_v8 }
 0x6e6   :  { %2240 = vmatpush3.msra.mxu1 %v1991_v8 }
 0x6e7   :  { %2241 = vmatprep.subr.mxu1 %v1990_v10 }
 0x6e8   :  { %2242 = vmatpush3.msra.mxu1 %v1990_v10 }
 0x6e9   :  { %2243 = vmatprep.subr.mxu1 %v1989_v11 }
 0x6ea   :  { %2244 = vmatpush3.msra.mxu1 %v1989_v11 }
 0x7a3   :  { %v2217_v37 = vpop.f32.mrf.mxu1 }
 0x7a4   :  { %v828_v38 = vadd.f32 %v2217_v37, %v749_v34 }
 0x7a5   :  { %v822_v40 = vpop.f32.mrf.mxu1 }
 0x7a6   :  { %v823_v44 = vadd.f32 %v822_v40, %v749_v34  ;;  %v832_v46 = vmax.f32 %v828_v38, 0.0 }
 0x7a8   :  { %v831_v45 = vmax.f32 %v823_v44, 0.0  ;;  %v964_v44 = vrot.slane %v2531_v17, %v963_v30 }
 0x7aa   :  { %2234 = vmatprep.mubr.msk.f32.mxu0 %vm845_vm2, %v831_v45 }
 0x7ab   :  { %2235 = vmatmul.mubr.msk.f32.vlgmr.msra.gmra.mxu0 %vm845_vm2, %v832_v46 }
 0x86b   :  { %v2236_v42 = vpop.f32.mrf.mxu0 }
 0x86c   :  { %v924_v51 = vadd.f32 %v2236_v42, %v844_v49  ;;  %v2815_v42 = vld [vmem:[%s3029_s7 + $0x8] sm:$0xff] }
 0x86d   :  { %v918_v52 = vpop.f32.mrf.mxu0  ;;  %v977_v17 = vrot.slane %v2815_v42, %v144_v16 }
 0x86e   :  { %v919_v13 = vadd.f32 %v918_v52, %v844_v49  ;;  %v928_v12 = vadd.f32 %v924_v51, %v741_v23 }
 0x870   :  { %v932_v53 = vsel %vm146_vm1, %v928_v12, 0.0  ;;  %v927_v54 = vadd.f32 %v919_v13, %v740_v24 }
 0x871   :  { %933 = vadd.xlane.f32.xlu0 %v932_v53 }
 0x872   :  { %v929_v56 = vsel %vm146_vm1, %v927_v54, 0.0 }
 0x873   :  { %930 = vadd.xlane.f32.xlu1 %v929_v56 }
 0x8fa   :  { %v934_v57 = vpop.xlane.xlu0 %933 }
 0x8fb   :  { %v936_v58 = vmul.f32 0.03125, %v934_v57 }
 0x8fc   :  { %v931_v59 = vpop.xlane.xlu1 %930 }
 0x8fd   :  { %v938_v60 = vsub.f32 %v928_v12, %v936_v58  ;;  %v935_v62 = vmul.f32 0.03125, %v931_v59 }
 0x8ff   :  { %v937_v63 = vsub.f32 %v927_v54, %v935_v62  ;;  %v940_v0 = vmul.f32 %v938_v60, %v938_v60 }
 0x901   :  { %v944_v1 = vsel %vm146_vm1, %v940_v0, 0.0  ;;  %v939_v3 = vmul.f32 %v937_v63, %v937_v63 }
 0x902   :  { %945 = vadd.xlane.f32.xlu0 %v944_v1 }
 0x903   :  { %v941_v4 = vsel %vm146_vm1, %v939_v3, 0.0 }
 0x904   :  { %942 = vadd.xlane.f32.xlu1 %v941_v4 }
 0x98b   :  { %v946_v14 = vpop.xlane.xlu0 %945 }
 0x98c   :  { %v948_v18 = vmul.f32 0.03125, %v946_v14 }
 0x98d   :  { %v943_v19 = vpop.xlane.xlu1 %942 }
 0x98e   :  { %v950_v21 = vadd.f32 1e-05, %v948_v18  ;;  %v947_v24 = vmul.f32 0.03125, %v943_v19 }
 0x990   :  { %2379 = vrsqrt.f32 %v950_v21  ;;  %v949_v23 = vadd.f32 1e-05, %v947_v24 }
 0x992   :  { %2381 = vrsqrt.f32 %v949_v23 }
 0x99d   :  { %v2380_v26 = vpop.eup %2379 }
 0x99e   :  { %v954_v34 = vmul.f32 %v2380_v26, %v938_v60 }
 0x99f   :  { %v2382_v37 = vpop.eup %2381 }
 0x9a0   :  { %v953_v38 = vmul.f32 %v2382_v37, %v937_v63  ;;  %v960_v40 = vmul.f32 %v958_v29, %v954_v34 }
 0x9a2   :  { %v959_v45 = vmul.f32 %v958_v29, %v953_v38  ;;  %v2806_v49 = vadd.f32 %v964_v44, %v960_v40 }
 0x9a4   :  { %v2804_v46 = vadd.f32 %v964_v44, %v959_v45 }
 0x9a6   :  { %2245 = vmatprep.mubr.msk.f32.mxu1 %vm146_vm1, %v2804_v46 }
 0x9a7   :  { %2246 = vmatmul.mubr.msk.f32.vlgmr.msra.gmra.mxu1 %vm146_vm1, %v2806_v49 }
 0xa67   :  { %v2247_v51 = vpop.f32.mrf.mxu1 }
 0xa68   :  { %v2820_v52 = vadd.f32 %v2247_v51, %v977_v17 }
 0xa69   :  { %v1050_v13 = vpop.f32.mrf.mxu1 }
 0xa6a   :  { %v2822_v12 = vadd.f32 %v1050_v13, %v977_v17  ;;  %1071 = vrot.lane.b32.xlu1 %v2820_v52, %s2431_s11  ;;  %v1060_v56 = vmul.f32 %v2820_v52, %v2557_v27  ;;  %v1064_v27 = vmul.f32 %v2820_v52, %v2589_v35 }
 0xa6c   :  { %1069 = vrot.lane.b32.xlu0 %v2822_v12, %s2431_s11  ;;  %v1059_v53 = vmul.f32 %v2822_v12, %v2541_v22  ;;  %v1061_v57 = vmul.f32 %v2822_v12, %v2563_v28  ;;  %v1062_v22 = vmul.f32 %v2820_v52, %v2573_v31  ;;  %v1063_v58 = vmul.f32 %v2822_v12, %v2579_v32 }
 0xa6d   :  { %v1065_v28 = vmul.f32 %v2822_v12, %v2595_v36  ;;  %v1066_v31 = vmul.f32 %v2820_v52, %v2605_v39 }
 0xa6e   :  { %2252 = vmatprep.mubr.msk.f32.mxu1 %vm146_vm1, %v1059_v53 }
 0xadc   :  { %v1072_v54 = vpop.permute.xlu1 %1071 }
 0xadd   :  { %2248 = vmatprep.subr.msk.mxu1 %vm146_vm1, %v1072_v54 }
 0xade   :  { %2249 = vmatpush3.xpose.msk.msra.mxu1 %vm146_vm1, %v1072_v54  ;;  %v1070_v16 = vpop.permute.xlu0 %1069 }
 0xadf   :  { %2250 = vmatprep.subr.msk.mxu1 %vm146_vm1, %v1070_v16 }
 0xae2   :  { %2251 = vmatpush3.xpose.msk.msra.mxu1 %vm146_vm1, %v1070_v16 }
 0xae5   :  { %2253 = vmatmul.mubr.msk.f32.vlgmr.msra.gmra.mxu1 %vm146_vm1, %v1060_v56 }
 0xae6   :  { %2255 = vmatprep.mubr.msk.f32.mxu1 %vm146_vm1, %v1061_v57 }
 0xae9   :  { %2256 = vmatmul.mubr.msk.f32.gmra.mxu1 %vm146_vm1, %v1062_v22 }
 0xaea   :  { %2258 = vmatprep.mubr.msk.f32.mxu1 %vm146_vm1, %v1063_v58 }
 0xaed   :  { %2259 = vmatmul.mubr.msk.f32.gmra.mxu1 %vm146_vm1, %v1064_v27 }
 0xaee   :  { %2261 = vmatprep.mubr.msk.f32.mxu1 %vm146_vm1, %v1065_v28 }
 0xaf1   :  { %2262 = vmatmul.mubr.msk.f32.gmra.mxu1 %vm146_vm1, %v1066_v31 }
 0xba5   :  { %v2254_v32 = vpop.f32.mrf.mxu1 }
 0xba6   :  { %v1173_v59 = vadd.f32 %v2254_v32, %v2615_v41 }
 0xba7   :  { %v1167_v60 = vpop.f32.mrf.mxu1 }
 0xba8   :  { %v1168_v62 = vadd.f32 %v1167_v60, %v2620_v43  ;;  %v1209_v35 = vsel %vm55_vm0, %v1173_v59, -inf }
 0xba9   :  { %1210 = vmax.xlane.f32.xlu0 %v1209_v35  ;;  %v2257_v63 = vpop.f32.mrf.mxu1 }
 0xbaa   :  { %v1183_v36 = vadd.f32 %v2257_v63, %v2628_v48  ;;  %v1206_v0 = vsel %vm55_vm0, %v1168_v62, -inf }
 0xbab   :  { %v1177_v1 = vpop.f32.mrf.mxu1  ;;  %1207 = vmax.xlane.f32.xlu1 %v1206_v0 }
 0xbac   :  { %v1178_v39 = vadd.f32 %v1177_v1, %v2633_v50  ;;  %v1215_v3 = vsel %vm55_vm0, %v1183_v36, -inf }
 0xbad   :  { %1216 = vmax.xlane.f32.xlu0 %v1215_v3  ;;  %v2260_v4 = vpop.f32.mrf.mxu1 }
 0xbae   :  { %v1193_v41 = vadd.f32 %v2260_v4, %v2641_v55  ;;  %v1212_v43 = vsel %vm55_vm0, %v1178_v39, -inf }
 0xbaf   :  { %v1187_v7 = vpop.f32.mrf.mxu1  ;;  %1213 = vmax.xlane.f32.xlu1 %v1212_v43 }
 0xbb0   :  { %v1188_v8 = vadd.f32 %v1187_v7, %v2649_v61  ;;  %v1221_v48 = vsel %vm55_vm0, %v1193_v41, -inf }
 0xbb1   :  { %1222 = vmax.xlane.f32.xlu0 %v1221_v48  ;;  %v2263_v10 = vpop.f32.mrf.mxu1 }
 0xbb2   :  { %v1203_v11 = vadd.f32 %v2263_v10, %v2663_v5  ;;  %v1218_v50 = vsel %vm55_vm0, %v1188_v8, -inf }
 0xbb3   :  { %v1197_v14 = vpop.f32.mrf.mxu1  ;;  %1219 = vmax.xlane.f32.xlu1 %v1218_v50 }
 0xbb4   :  { %v1198_v18 = vadd.f32 %v1197_v14, %v2656_v2  ;;  %v1227_v55 = vsel %vm55_vm0, %v1203_v11, -inf }
 0xbb5   :  { %1228 = vmax.xlane.f32.xlu0 %v1227_v55 }
 0xbb6   :  { %v1224_v19 = vsel %vm55_vm0, %v1198_v18, -inf }
 0xbb7   :  { %1225 = vmax.xlane.f32.xlu1 %v1224_v19 }
 0xc32   :  { %v1211_v21 = vpop.xlane.xlu0 %1210 }
 0xc33   :  { %v1231_v61 = vsub.f32 %v1173_v59, %v1211_v21 }
 0xc34   :  { %v1208_v24 = vpop.xlane.xlu1 %1207 }
 0xc35   :  { %v1240_v23 = vmul.f32 1.442695, %v1231_v61  ;;  %v1230_v26 = vsub.f32 %v1168_v62, %v1208_v24 }
 0xc36   :  { %v1217_v29 = vpop.xlane.xlu0 %1216 }
 0xc37   :  { %2383 = vpow2.f32 %v1240_v23  ;;  %v1238_v5 = vmul.f32 1.442695, %v1230_v26  ;;  %v1233_v34 = vsub.f32 %v1183_v36, %v1217_v29 }
 0xc38   :  { %v1214_v37 = vpop.xlane.xlu1 %1213 }
 0xc39   :  { %2385 = vpow2.f32 %v1238_v5  ;;  %v1244_v38 = vmul.f32 1.442695, %v1233_v34  ;;  %v1232_v40 = vsub.f32 %v1178_v39, %v1214_v37 }
 0xc3a   :  { %v1223_v2 = vpop.xlane.xlu0 %1222 }
 0xc3b   :  { %2387 = vpow2.f32 %v1244_v38  ;;  %v1242_v44 = vmul.f32 1.442695, %v1232_v40  ;;  %v1235_v45 = vsub.f32 %v1193_v41, %v1223_v2 }
 0xc3c   :  { %v1220_v17 = vpop.xlane.xlu1 %1219 }
 0xc3d   :  { %2389 = vpow2.f32 %v1242_v44  ;;  %v1248_v51 = vmul.f32 1.442695, %v1235_v45  ;;  %v1234_v13 = vsub.f32 %v1188_v8, %v1220_v17  ;;  %v2016_v45 = vld [vmem:[%s3031_s4 + $0x38] sm:$0xff]  ;;  %v2015_v17 = vld [vmem:[%s3031_s4 + $0x30] sm:$0xff] }
 0xc3e   :  { %v1229_v53 = vpop.xlane.xlu0 %1228  ;;  %2280 = vmatprep.subr.mxu1 %v2016_v45 }
 0xc3f   :  { %2391 = vpow2.f32 %v1248_v51  ;;  %v1246_v54 = vmul.f32 1.442695, %v1234_v13  ;;  %v1237_v16 = vsub.f32 %v1203_v11, %v1229_v53  ;;  %2281 = vmatpush3.msra.mxu1 %v2016_v45  ;;  %v2014_v51 = vld [vmem:[%s3031_s4 + $0x28] sm:$0xff]  ;;  %v2013_v13 = vld [vmem:[%s3031_s4 + $0x20] sm:$0xff] }
 0xc40   :  { %v1226_v56 = vpop.xlane.xlu1 %1225  ;;  %2282 = vmatprep.subr.mxu1 %v2015_v17  ;;  %v2019_v45 = vld [vmem:[%s3032_s5 + $0x20] sm:$0xff] }
 0xc41   :  { %2393 = vpow2.f32 %v1246_v54  ;;  %v1252_v57 = vmul.f32 1.442695, %v1237_v16  ;;  %v1236_v22 = vsub.f32 %v1198_v18, %v1226_v56  ;;  %2283 = vmatpush3.msra.mxu1 %v2015_v17  ;;  %v2032_v17 = vld [vmem:[%s3033_s6 + $0x78] sm:$0xff] }
 0xc42   :  { %2284 = vmatprep.subr.mxu1 %v2014_v51 }
 0xc43   :  { %2395 = vpow2.f32 %v1252_v57  ;;  %v1250_v58 = vmul.f32 1.442695, %v1236_v22  ;;  %2285 = vmatpush3.msra.mxu1 %v2014_v51  ;;  %v2423_v22 = vld [vmem:[%s3026_s1 + $0x30] sm:$0xff] }
 0xc44   :  { %v2384_v27 = vpop.eup %2383  ;;  %2286 = vmatprep.subr.mxu1 %v2013_v13  ;;  %v2031_v51 = vld [vmem:[%s3033_s6 + $0x70] sm:$0xff] }
 0xc45   :  { %2397 = vpow2.f32 %v1250_v58  ;;  %v1257_v28 = vsel %vm55_vm0, %v2384_v27, 0.0  ;;  %2287 = vmatpush3.msra.mxu1 %v2013_v13  ;;  %v2030_v13 = vld [vmem:[%s3033_s6 + $0x68] sm:$0xff] }
 0xc46   :  { %v2386_v31 = vpop.eup %2385  ;;  %1258 = vadd.xlane.f32.xlu0 %v1257_v28  ;;  %2302 = vmatprep.subr.mxu1 %v2032_v17 }
 0xc47   :  { %v1254_v32 = vsel %vm55_vm0, %v2386_v31, 0.0 }
 0xc48   :  { %v2388_v59 = vpop.eup %2387  ;;  %1255 = vadd.xlane.f32.xlu1 %v1254_v32  ;;  %v2425_v32 = vld [vmem:[%s3026_s1 + $0x20] sm:$0xff] }
 0xc49   :  { %v1263_v60 = vsel %vm55_vm0, %v2388_v59, 0.0 }
 0xc4a   :  { %v2390_v62 = vpop.eup %2389  ;;  %1264 = vadd.xlane.f32.xlu0 %v1263_v60  ;;  %v2426_v60 = vld [vmem:[%s3026_s1 + $0x40] sm:$0xff] }
 0xc4b   :  { %v1260_v35 = vsel %vm55_vm0, %v2390_v62, 0.0 }
 0xc4c   :  { %v2392_v63 = vpop.eup %2391  ;;  %1261 = vadd.xlane.f32.xlu1 %v1260_v35  ;;  %v2427_v35 = vld [vmem:[%s3026_s1 + $0x28] sm:$0xff] }
 0xc4d   :  { %v1269_v36 = vsel %vm55_vm0, %v2392_v63, 0.0 }
 0xc4e   :  { %v2394_v0 = vpop.eup %2393  ;;  %1270 = vadd.xlane.f32.xlu0 %v1269_v36  ;;  %v2428_v36 = vld [vmem:[%s3026_s1 + $0x48] sm:$0xff] }
 0xc4f   :  { %v1266_v1 = vsel %vm55_vm0, %v2394_v0, 0.0 }
 0xc50   :  { %v2396_v39 = vpop.eup %2395  ;;  %1267 = vadd.xlane.f32.xlu1 %v1266_v1 }
 0xc51   :  { %v1275_v3 = vsel %vm55_vm0, %v2396_v39, 0.0 }
 0xc52   :  { %v2398_v4 = vpop.eup %2397  ;;  %1276 = vadd.xlane.f32.xlu0 %v1275_v3 }
 0xc53   :  { %v1272_v41 = vsel %vm55_vm0, %v2398_v4, 0.0 }
 0xc54   :  { %1273 = vadd.xlane.f32.xlu1 %v1272_v41 }
 0xc65   :  { %1296 = vrot.lane.b32.xlu1 %v2820_v52, %s2432_s21 }
 0xc68   :  { %1294 = vrot.lane.b32.xlu0 %v2822_v12, %s2432_s21 }
 0xccf   :  { %v1259_v43 = vpop.xlane.xlu0 %1258 }
 0xcd1   :  { %v1256_v7 = vpop.xlane.xlu1 %1255 }
 0xcd2   :  { %2399 = vrcp.f32 %v1256_v7 }
 0xcd3   :  { %v1265_v8 = vpop.xlane.xlu0 %1264  ;;  %2401 = vrcp.f32 %v1259_v43 }
 0xcd5   :  { %v1262_v48 = vpop.xlane.xlu1 %1261 }
 0xcd6   :  { %2403 = vrcp.f32 %v1262_v48 }
 0xcd7   :  { %v1271_v10 = vpop.xlane.xlu0 %1270  ;;  %2405 = vrcp.f32 %v1265_v8  ;;  %v2430_v8 = vld [vmem:[%s3026_s1 + $0x50] sm:$0xff] }
 0xcd9   :  { %v1268_v11 = vpop.xlane.xlu1 %1267 }
 0xcda   :  { %2407 = vrcp.f32 %v1268_v11 }
 0xcdb   :  { %2409 = vrcp.f32 %v1271_v10  ;;  %v1277_v50 = vpop.xlane.xlu0 %1276 }
 0xcdd   :  { %v1274_v14 = vpop.xlane.xlu1 %1273 }
 0xcde   :  { %2411 = vrcp.f32 %v1274_v14  ;;  %v1451_v14 = vrot.slane %v2815_v42, %v618_v20 }
 0xcdf   :  { %v2400_v18 = vpop.eup %2399  ;;  %2413 = vrcp.f32 %v1277_v50  ;;  %v1295_v21 = vpop.permute.xlu0 %1294 }
 0xce0   :  { %v1286_v52 = vmul.f32 %v2400_v18, %v2386_v31  ;;  %v2402_v55 = vpop.eup %2401 }
 0xce1   :  { %v1297_v12 = vpop.permute.xlu1 %1296  ;;  %v1287_v61 = vmul.f32 %v2402_v55, %v2384_v27  ;;  %v2424_v27 = vld [vmem:[%s3026_s1 + $0x38] sm:$0xff] }
 0xce2   :  { %2264 = vmatprep.subr.mxu0 %v1297_v12  ;;  %2268 = vmatprep.mubr.msk.f32.mxu0 %vm55_vm0, %v1286_v52 }
 0xce3   :  { %v2404_v19 = vpop.eup %2403  ;;  %2265 = vmatpush3.msra.mxu0 %v1297_v12 }
 0xce4   :  { %2266 = vmatprep.subr.mxu0 %v1295_v21  ;;  %v1288_v24 = vmul.f32 %v2404_v19, %v2390_v62  ;;  %v2406_v23 = vpop.eup %2405 }
 0xce5   :  { %2267 = vmatpush3.msra.mxu0 %v1295_v21  ;;  %v1289_v29 = vmul.f32 %v2406_v23, %v2388_v59 }
 0xce6   :  { %2269 = vmatmul.mubr.msk.f32.vlgmr.msra.gmra.mxu0 %vm55_vm0, %v1287_v61 }
 0xce7   :  { %v2408_v26 = vpop.eup %2407  ;;  %2271 = vmatprep.mubr.msk.f32.mxu0 %vm55_vm0, %v1288_v24 }
 0xce8   :  { %v1290_v5 = vmul.f32 %v2408_v26, %v2394_v0  ;;  %v2410_v34 = vpop.eup %2409 }
 0xce9   :  { %v1291_v38 = vmul.f32 %v2410_v34, %v2392_v63 }
 0xcea   :  { %2272 = vmatmul.mubr.msk.f32.gmra.mxu0 %vm55_vm0, %v1289_v29 }
 0xceb   :  { %v2412_v37 = vpop.eup %2411  ;;  %2274 = vmatprep.mubr.msk.f32.mxu0 %vm55_vm0, %v1290_v5 }
 0xcec   :  { %v1292_v40 = vmul.f32 %v2412_v37, %v2398_v4  ;;  %v2414_v2 = vpop.eup %2413  ;;  %v2429_v4 = vld [vmem:[%s3026_s1 + $0x58] sm:$0xff] }
 0xced   :  { %v1293_v44 = vmul.f32 %v2414_v2, %v2396_v39  ;;  %v2021_v2 = vld [vmem:[%s3032_s5 + $0x30] sm:$0xff] }
 0xcee   :  { %2275 = vmatmul.mubr.msk.f32.gmra.mxu0 %vm55_vm0, %v1291_v38 }
 0xcef   :  { %2277 = vmatprep.mubr.msk.f32.mxu0 %vm55_vm0, %v1292_v40 }
 0xcf2   :  { %2278 = vmatmul.mubr.msk.f32.gmra.mxu0 %vm55_vm0, %v1293_v44  ;;  %v2020_v44 = vld [vmem:[%s3032_s5 + $0x28] sm:$0xff] }
 0xda6   :  { %v2270_v53 = vpop.f32.mrf.mxu0 }
 0xda7   :  { %v1430_v63 = vmul.f32 %v2427_v35, %v2270_v53  ;;  %v2029_v53 = vld [vmem:[%s3033_s6 + $0x60] sm:$0xff] }
 0xda8   :  { %v1390_v54 = vpop.f32.mrf.mxu0 }
 0xda9   :  { %v1429_v59 = vmul.f32 %v2425_v32, %v1390_v54 }
 0xdaa   :  { %v2273_v16 = vpop.f32.mrf.mxu0 }
 0xdab   :  { %v1432_v28 = vmul.f32 %v2424_v27, %v2273_v16 }
 0xdac   :  { %v1400_v56 = vpop.f32.mrf.mxu0 }
 0xdad   :  { %v1431_v58 = vmul.f32 %v2423_v22, %v1400_v56  ;;  %v1438_v3 = vadd.f32 %v1432_v28, %v1430_v63  ;;  %v1564_v28 = vrot.slane %v2815_v42, %v732_v6  ;;  %v2027_v6 = vld [vmem:[%s3033_s6 + $0x50] sm:$0xff] }
 0xdae   :  { %v2276_v57 = vpop.f32.mrf.mxu0 }
 0xdaf   :  { %v1434_v0 = vmul.f32 %v2428_v36, %v2276_v57  ;;  %v1437_v39 = vadd.f32 %v1431_v58, %v1429_v59 }
 0xdb0   :  { %v1410_v31 = vpop.f32.mrf.mxu0 }
 0xdb1   :  { %v1433_v62 = vmul.f32 %v2426_v60, %v1410_v31  ;;  %v1440_v10 = vadd.f32 %v1438_v3, %v1434_v0  ;;  %v2028_v0 = vld [vmem:[%s3033_s6 + $0x58] sm:$0xff] }
 0xdb2   :  { %v2279_v1 = vpop.f32.mrf.mxu0 }
 0xdb3   :  { %v1436_v41 = vmul.f32 %v2429_v4, %v2279_v1  ;;  %v1439_v7 = vadd.f32 %v1437_v39, %v1433_v62  ;;  %v1570_v62 = vrot.slane %v2815_v42, %v738_v9  ;;  %v2026_v9 = vld [vmem:[%s3033_s6 + $0x48] sm:$0xff]  ;;  %v2025_v1 = vld [vmem:[%s3033_s6 + $0x40] sm:$0xff]  ;;  %v1581_v39 = vrot.slane %v2815_v42, %v748_v33 }
 0xdb4   :  { %v1420_v43 = vpop.f32.mrf.mxu0 }
 0xdb5   :  { %v1435_v48 = vmul.f32 %v2430_v8, %v1420_v43  ;;  %v1442_v50 = vadd.f32 %v1440_v10, %v1436_v41 }
 0xdb7   :  { %v1441_v11 = vadd.f32 %v1439_v7, %v1435_v48  ;;  %v1677_v48 = vrot.slane %v2815_v42, %v843_v47 }
 0xdb9   :  { %2288 = vmatprep.mubr.msk.f32.mxu1 %vm146_vm1, %v1441_v11 }
 0xdba   :  { %2289 = vmatmul.mubr.msk.f32.vlgmr.msra.gmra.mxu1 %vm146_vm1, %v1442_v50 }
 0xdbb   :  { %2303 = vmatpush3.msra.mxu1 %v2032_v17  ;;  %v1796_v17 = vrot.slane %v2815_v42, %v963_v30  ;;  %v1873_v30 = vld [vmem:[%s3034_s8 + $0x8] sm:$0xff] }
 0xdbc   :  { %2304 = vmatprep.subr.mxu1 %v2031_v51 }
 0xdbd   :  { %2305 = vmatpush3.msra.mxu1 %v2031_v51 }
 0xdbe   :  { %2306 = vmatprep.subr.mxu1 %v2030_v13 }
 0xdbf   :  { %2307 = vmatpush3.msra.mxu1 %v2030_v13 }
 0xdc0   :  { %2308 = vmatprep.subr.mxu1 %v2029_v53 }
 0xdc1   :  { %2309 = vmatpush3.msra.mxu1 %v2029_v53 }
 0xdc2   :  { %2310 = vmatprep.subr.mxu1 %v2028_v0 }
 0xdc3   :  { %2311 = vmatpush3.msra.mxu1 %v2028_v0 }
 0xdc4   :  { %2312 = vmatprep.subr.mxu1 %v2027_v6 }
 0xdc5   :  { %2313 = vmatpush3.msra.mxu1 %v2027_v6 }
 0xdc6   :  { %2314 = vmatprep.subr.mxu1 %v2026_v9 }
 0xdc7   :  { %2315 = vmatpush3.msra.mxu1 %v2026_v9 }
 0xdc8   :  { %2316 = vmatprep.subr.mxu1 %v2025_v1 }
 0xdc9   :  { %2317 = vmatpush3.msra.mxu1 %v2025_v1 }
 0xe7a   :  { %v2290_v18 = vpop.f32.mrf.mxu1 }
 0xe7b   :  { %v1530_v52 = vadd.f32 %v2290_v18, %v1451_v14 }
 0xe7c   :  { %v1524_v55 = vpop.f32.mrf.mxu1 }
 0xe7d   :  { %v1525_v12 = vadd.f32 %v1524_v55, %v1451_v14  ;;  %v1534_v19 = vadd.f32 %v1530_v52, %v2806_v49 }
 0xe7f   :  { %v1538_v21 = vsel %vm146_vm1, %v1534_v19, 0.0  ;;  %v1533_v61 = vadd.f32 %v1525_v12, %v2804_v46  ;;  %v2022_v46 = vld [vmem:[%s3032_s5 + $0x38] sm:$0xff] }
 0xe80   :  { %1539 = vadd.xlane.f32.xlu0 %v1538_v21  ;;  %2291 = vmatprep.subr.mxu0 %v2022_v46 }
 0xe81   :  { %v1535_v24 = vsel %vm146_vm1, %v1533_v61, 0.0  ;;  %2292 = vmatpush3.msra.mxu0 %v2022_v46 }
 0xe82   :  { %1536 = vadd.xlane.f32.xlu1 %v1535_v24  ;;  %2293 = vmatprep.subr.mxu0 %v2021_v2 }
 0xe83   :  { %2294 = vmatpush3.msra.mxu0 %v2021_v2  ;;  %v1790_v2 = vrot.slane %v2815_v42, %v957_v25  ;;  %v1875_v25 = vld [vmem:[%s3034_s8 + $0x18] sm:$0xff]  ;;  %v1872_v42 = vld [vmem:[%s3034_s8] sm:$0xff] }
 0xe84   :  { %2295 = vmatprep.subr.mxu0 %v2020_v44 }
 0xe85   :  { %2296 = vmatpush3.msra.mxu0 %v2020_v44 }
 0xe86   :  { %2297 = vmatprep.subr.mxu0 %v2019_v45 }
 0xe87   :  { %2298 = vmatpush3.msra.mxu0 %v2019_v45 }
 0xf09   :  { %v1540_v23 = vpop.xlane.xlu0 %1539 }
 0xf0a   :  { %v1542_v26 = vmul.f32 0.03125, %v1540_v23 }
 0xf0b   :  { %v1537_v29 = vpop.xlane.xlu1 %1536 }
 0xf0c   :  { %v1544_v5 = vsub.f32 %v1534_v19, %v1542_v26  ;;  %v1541_v34 = vmul.f32 0.03125, %v1537_v29 }
 0xf0e   :  { %v1543_v20 = vsub.f32 %v1533_v61, %v1541_v34  ;;  %v1546_v37 = vmul.f32 %v1544_v5, %v1544_v5  ;;  %v2433_v34 = vmov 0.0  }
 0xf0f   :  { %2321 = vmatprep.subr.mxu0 %v2433_v34 }
 0xf10   :  { %v1550_v38 = vsel %vm146_vm1, %v1546_v37, 0.0  ;;  %v1545_v40 = vmul.f32 %v1543_v20, %v1543_v20 }
 0xf11   :  { %1551 = vadd.xlane.f32.xlu0 %v1550_v38 }
 0xf12   :  { %v1547_v49 = vsel %vm146_vm1, %v1545_v40, 0.0 }
 0xf13   :  { %1548 = vadd.xlane.f32.xlu1 %v1547_v49 }
 0xf9a   :  { %v1552_v54 = vpop.xlane.xlu0 %1551 }
 0xf9b   :  { %v1554_v16 = vmul.f32 0.03125, %v1552_v54 }
 0xf9c   :  { %v1549_v56 = vpop.xlane.xlu1 %1548 }
 0xf9d   :  { %v1556_v57 = vadd.f32 1e-05, %v1554_v16  ;;  %v1553_v22 = vmul.f32 0.03125, %v1549_v56 }
 0xf9f   :  { %2415 = vrsqrt.f32 %v1556_v57  ;;  %v1555_v58 = vadd.f32 1e-05, %v1553_v22  ;;  %v52_v57 = vld [vmem:[%s3030_s2 + $0x40] sm:$0x3] }
 0xfa1   :  { %2417 = vrsqrt.f32 %v1555_v58 }
 0xfac   :  { %v2416_v27 = vpop.eup %2415 }
 0xfad   :  { %v1560_v31 = vmul.f32 %v2416_v27, %v1544_v5  ;;  %v2036_v27 = vld [vmem:[%s3034_s8 + $0x20] ss:$0 sm:$0xff] }
 0xfae   :  { %v2418_v32 = vpop.eup %2417 }
 0xfaf   :  { %v1559_v59 = vmul.f32 %v2418_v32, %v1543_v20  ;;  %v1566_v60 = vmul.f32 %v1564_v28, %v1560_v31 }
 0xfb1   :  { %v1565_v35 = vmul.f32 %v1564_v28, %v1559_v59  ;;  %v1572_v36 = vadd.f32 %v1570_v62, %v1566_v60 }
 0xfb3   :  { %v1571_v63 = vadd.f32 %v1570_v62, %v1565_v35 }
 0xfb5   :  { %2299 = vmatprep.mubr.msk.f32.mxu0 %vm146_vm1, %v1571_v63 }
 0xfb6   :  { %2300 = vmatmul.mubr.msk.f32.vlgmr.msra.gmra.mxu0 %vm146_vm1, %v1572_v36 }
 0xfb7   :  { %2325 = vmatprep.mubr.msk.f32.mxu0 %vm2434_vm3, %v2433_v34 }
0x1076   :  { %v2301_v3 = vpop.f32.mrf.mxu0 }
0x1077   :  { %v1660_v4 = vadd.f32 %v2301_v3, %v1581_v39 }
0x1078   :  { %v1654_v41 = vpop.f32.mrf.mxu0 }
0x1079   :  { %v1655_v43 = vadd.f32 %v1654_v41, %v1581_v39  ;;  %v1664_v8 = vmax.f32 %v1660_v4, 0.0 }
0x107b   :  { %v1663_v7 = vmax.f32 %v1655_v43, 0.0 }
0x107d   :  { %2318 = vmatprep.mubr.msk.f32.mxu1 %vm845_vm2, %v1663_v7 }
0x107e   :  { %2319 = vmatmul.mubr.msk.f32.vlgmr.msra.gmra.mxu1 %vm845_vm2, %v1664_v8 }
0x113e   :  { %v2320_v10 = vpop.f32.mrf.mxu1 }
0x113f   :  { %v1756_v11 = vadd.f32 %v2320_v10, %v1677_v48 }
0x1140   :  { %v1750_v50 = vpop.f32.mrf.mxu1 }
0x1141   :  { %v1751_v14 = vadd.f32 %v1750_v50, %v1677_v48  ;;  %v1760_v18 = vadd.f32 %v1756_v11, %v1572_v36 }
0x1143   :  { %v1764_v33 = vsel %vm146_vm1, %v1760_v18, 0.0  ;;  %v1759_v52 = vadd.f32 %v1751_v14, %v1571_v63 }
0x1144   :  { %1765 = vadd.xlane.f32.xlu1 %v1764_v33 }
0x1145   :  { %v1761_v55 = vsel %vm146_vm1, %v1759_v52, 0.0 }
0x1146   :  { %1762 = vadd.xlane.f32.xlu0 %v1761_v55 }
0x11cd   :  { %v1766_v12 = vpop.xlane.xlu1 %1765 }
0x11ce   :  { %v1768_v19 = vmul.f32 0.03125, %v1766_v12 }
0x11cf   :  { %v1763_v21 = vpop.xlane.xlu0 %1762 }
0x11d0   :  { %v1770_v61 = vsub.f32 %v1760_v18, %v1768_v19  ;;  %v1767_v24 = vmul.f32 0.03125, %v1763_v21 }
0x11d2   :  { %v1769_v23 = vsub.f32 %v1759_v52, %v1767_v24  ;;  %v1772_v26 = vmul.f32 %v1770_v61, %v1770_v61 }
0x11d4   :  { %v1776_v47 = vsel %vm146_vm1, %v1772_v26, 0.0  ;;  %v1771_v29 = vmul.f32 %v1769_v23, %v1769_v23 }
0x11d5   :  { %1777 = vadd.xlane.f32.xlu1 %v1776_v47 }
0x11d6   :  { %v1773_v5 = vsel %vm146_vm1, %v1771_v29, 0.0 }
0x11d7   :  { %1774 = vadd.xlane.f32.xlu0 %v1773_v5 }
0x125e   :  { %v1778_v20 = vpop.xlane.xlu1 %1777 }
0x125f   :  { %v1780_v37 = vmul.f32 0.03125, %v1778_v20 }
0x1260   :  { %v1775_v38 = vpop.xlane.xlu0 %1774 }
0x1261   :  { %v1782_v40 = vadd.f32 1e-05, %v1780_v37  ;;  %v1779_v49 = vmul.f32 0.03125, %v1775_v38 }
0x1263   :  { %2419 = vrsqrt.f32 %v1782_v40  ;;  %v1781_v46 = vadd.f32 1e-05, %v1779_v49 }
0x1265   :  { %2421 = vrsqrt.f32 %v1781_v46 }
0x1270   :  { %v2420_v44 = vpop.eup %2419 }
0x1271   :  { %v1786_v45 = vmul.f32 %v2420_v44, %v1770_v61 }
0x1272   :  { %v2422_v51 = vpop.eup %2421 }
0x1273   :  { %v1792_v13 = vmul.f32 %v1790_v2, %v1786_v45  ;;  %v1785_v53 = vmul.f32 %v2422_v51, %v1769_v23 }
0x1275   :  { %v1798_v54 = vadd.f32 %v1796_v17, %v1792_v13  ;;  %v1791_v16 = vmul.f32 %v1790_v2, %v1785_v53 }
0x1277   :  { %2322 = vmatpush3.msra.mxu0 %v1798_v54  ;;  %v1797_v56 = vadd.f32 %v1796_v17, %v1791_v16 }
0x1278   :  { %2323 = vmatprep.subr.mxu0 %v2433_v34 }
0x1279   :  { %2324 = vmatpush3.msra.mxu0 %v1797_v56 }
0x127a   :  { %2326 = vmatmul.mubr.msk.f32.vlgmr.msra.gmra.mxu0 %vm55_vm0, %v52_v57  ;;  %2328 = vmatprep.subr.mxu0 %v2433_v34 }
0x127b   :  { %2329 = vmatpush3.msra.mxu0 %v1875_v25  ;;  %2336 = vmatprep.mubr.msk.f32.mxu0 %vm2434_vm3, %v2433_v34 }
0x127c   :  { %2330 = vmatprep.subr.mxu0 %v2433_v34 }
0x127d   :  { %2331 = vmatpush3.msra.mxu0 %v1874_v15 }
0x127e   :  { %2332 = vmatprep.subr.mxu0 %v2433_v34 }
0x127f   :  { %2333 = vmatpush3.msra.mxu0 %v1873_v30 }
0x1280   :  { %2334 = vmatprep.subr.mxu0 %v2433_v34 }
0x1281   :  { %2335 = vmatpush3.msra.mxu0 %v1872_v42 }
0x133a   :  { %v1868_v22 = vpop.f32.mrf.mxu0 }
0x133b   :  { %2337 = vmatmul.mubr.msk.f32.vlgmr.msra.gmra.mxu0 %vm146_vm1, %v1868_v22 }
0x133c   :  { %v2327_v58 = vpop.f32.mrf.mxu0 }
0x13fb   :  { %v1950_v28 = vpop.f32.mrf.mxu0 }
0x13fc   :  { %v1951_v31 = vadd.f32 %v2036_v27, %v1950_v28 }
0x13fd   :  { %v2338_v32 = vpop.f32.mrf.mxu0 }
0x13fe   :  { %1955 = vst.msk [vmem:[%s3035_s9] sm:$0x3] %vm1954_vm4, %v1951_v31 }

</bundles_post_ra>
